<compile_context>
chip_gen: v7x
topology: tpu7x:2x2x1
jax: 0.10.0
libtpu: 0.0.40
codegen_flags: <defaults>
</compile_context>

<pallas_src>
import functools

import jax
import jax.numpy as jnp
from jax import lax
from jax.experimental import pallas as pl
from jax.experimental.pallas import tpu as pltpu  # noqa: F401  (imported for TPU backend)

# ----------------------------- synthetic config ------------------------------
IN_CHANNELS = 16                      # backbone out channels
RESOLUTION = 4                        # cfg.MODEL.ROI_BOX_HEAD.POOLER_RESOLUTION
RECT_SIZE = RESOLUTION * 4 - 1        # default (non-LOGIN-masking) rect size
RECT_LANES = 256                      # RECT_SIZE*RECT_SIZE=225 padded lane-dense
MLP_DIM = 32                          # fc6/fc7 representation size
NUM_OBJ = 6
NUM_REL = 8
IMG_SIZE = (64, 64)                   # (width, height)
FEAT_HW = 32                          # single FPN level -> spatial_scale = 0.5
BN_EPS = 1e-5
LANE = 128


def _round_up(x, m):
    return (x + m - 1) // m * m


def _vspec(shape):
    return pl.BlockSpec(shape, lambda: (0,) * len(shape))


# ------------------------------ Pallas kernels -------------------------------
def _rect_mask_kernel(b_ref, xc_ref, yc_ref, o_ref):
    # b_ref: (2N, 4) box bounds [floor x1, floor y1, ceil x2, ceil y2]
    # xc/yc: (1, 256) precomputed lane coordinates (out-of-range lanes = -1e9)
    b = b_ref[...]
    xc = xc_ref[...]
    yc = yc_ref[...]
    m = ((xc >= b[:, 0:1]) & (xc <= b[:, 2:3]) &
         (yc >= b[:, 1:2]) & (yc <= b[:, 3:4]))
    o_ref[...] = m.astype(jnp.float32)


def rect_masks(hbounds, tbounds):
    """Build head/tail rectangle masks for all relations in ONE kernel call."""
    n = hbounds.shape[0]
    bounds = jnp.concatenate([hbounds, tbounds], axis=0).astype(jnp.float32)
    rows = bounds.shape[0]                                   # 2N
    p = jnp.arange(RECT_LANES)
    valid = p < RECT_SIZE * RECT_SIZE
    xc = jnp.where(valid, (p % RECT_SIZE).astype(jnp.float32), -1e9)
    yc = jnp.where(valid, (p // RECT_SIZE).astype(jnp.float32), -1e9)
    out = pl.pallas_call(
        _rect_mask_kernel,
        in_specs=[_vspec((rows, 4)), _vspec((1, RECT_LANES)),
                  _vspec((1, RECT_LANES))],
        out_specs=_vspec((rows, RECT_LANES)),
        out_shape=jax.ShapeDtypeStruct((rows, RECT_LANES), jnp.float32),
    )(bounds, xc.reshape(1, RECT_LANES), yc.reshape(1, RECT_LANES))
    masks = out[:, :RECT_SIZE * RECT_SIZE].reshape(2, n, RECT_SIZE, RECT_SIZE)
    return masks[0], masks[1]


def _fused_matmul_kernel(a_ref, w_ref, b_ref, s_ref, t_ref, o_ref, *, relu):
    # o = [relu](a @ w + b) * scale + shift ; bf16 operands, f32 accumulation
    y = jnp.dot(a_ref[...], w_ref[...], preferred_element_type=jnp.float32)
    y = y + b_ref[...]
    if relu:
        y = jnp.maximum(y, 0.0)
    o_ref[...] = y * s_ref[...] + t_ref[...]


def fused_linear(a, w, b=None, scale=None, shift=None, *, relu=True):
    """relu(a @ w + b) * scale + shift with K/Cout zero-padded to 128 multiples."""
    m, k = a.shape
    cout = w.shape[1]
    kp = _round_up(k, LANE)
    cp = _round_up(cout, LANE)
    if b is None:
        b = jnp.zeros((cout,), jnp.float32)
    if scale is None:
        scale = jnp.ones((cout,), jnp.float32)
    if shift is None:
        shift = jnp.zeros((cout,), jnp.float32)
    a_p = jnp.pad(a.astype(jnp.float32), ((0, 0), (0, kp - k))).astype(jnp.bfloat16)
    w_p = jnp.pad(w.astype(jnp.float32),
                  ((0, kp - k), (0, cp - cout))).astype(jnp.bfloat16)
    b_p = jnp.pad(b.astype(jnp.float32), (0, cp - cout)).reshape(1, cp)
    s_p = jnp.pad(scale.astype(jnp.float32), (0, cp - cout)).reshape(1, cp)
    t_p = jnp.pad(shift.astype(jnp.float32), (0, cp - cout)).reshape(1, cp)
    out = pl.pallas_call(
        functools.partial(_fused_matmul_kernel, relu=relu),
        in_specs=[_vspec((m, kp)), _vspec((kp, cp)), _vspec((1, cp)),
                  _vspec((1, cp)), _vspec((1, cp))],
        out_specs=_vspec((m, cp)),
        out_shape=jax.ShapeDtypeStruct((m, cp), jnp.float32),
    )(a_p, w_p, b_p, s_p, t_p)
    return out[:, :cout]


def _mlp_tail_kernel(v_ref, r_ref, w6_ref, b6_ref, w7_ref, b7_ref, o_ref):
    # fused: (vis + rect) -> fc6 -> ReLU -> fc7 -> ReLU (intermediate in vregs)
    x = (v_ref[...] + r_ref[...]).astype(jnp.bfloat16)
    h = jnp.dot(x, w6_ref[...], preferred_element_type=jnp.float32) + b6_ref[...]
    h = jnp.maximum(h, 0.0)
    y = jnp.dot(h.astype(jnp.bfloat16), w7_ref[...],
                preferred_element_type=jnp.float32) + b7_ref[...]
    o_ref[...] = jnp.maximum(y, 0.0)


def mlp_tail(vis_flat, rect_flat, w6, b6, w7, b7):
    m, k = vis_flat.shape
    d = w6.shape[1]
    kp = _round_up(k, LANE)
    dp = _round_up(d, LANE)
    v_p = jnp.pad(vis_flat.astype(jnp.float32), ((0, 0), (0, kp - k)))
    r_p = jnp.pad(rect_flat.astype(jnp.float32), ((0, 0), (0, kp - k)))
    w6_p = jnp.pad(w6.astype(jnp.float32),
                   ((0, kp - k), (0, dp - d))).astype(jnp.bfloat16)
    b6_p = jnp.pad(b6.astype(jnp.float32), (0, dp - d)).reshape(1, dp)
    w7_p = jnp.pad(w7.astype(jnp.float32),
                   ((0, dp - d), (0, dp - d))).astype(jnp.bfloat16)
    b7_p = jnp.pad(b7.astype(jnp.float32), (0, dp - d)).reshape(1, dp)
    out = pl.pallas_call(
        _mlp_tail_kernel,
        in_specs=[_vspec((m, kp)), _vspec((m, kp)), _vspec((kp, dp)),
                  _vspec((1, dp)), _vspec((dp, dp)), _vspec((1, dp))],
        out_specs=_vspec((m, dp)),
        out_shape=jax.ShapeDtypeStruct((m, dp), jnp.float32),
    )(v_p, r_p, w6_p, b6_p, w7_p, b7_p)
    return out[:, :d]


# ------------------------------ glue (plain JAX) ------------------------------
def im2col(x, k, stride, pad):
    """x: (N, C, H, W) -> patches (N*OH*OW, C*k*k), row order (n, oh, ow)."""
    n, c, h, w = x.shape
    oh = (h + 2 * pad - k) // stride + 1
    ow = (w + 2 * pad - k) // stride + 1
    xp = jnp.pad(x, ((0, 0), (0, 0), (pad, pad), (pad, pad)))
    cols = []
    for dy in range(k):
        for dx in range(k):
            cols.append(xp[:, :, dy:dy + stride * (oh - 1) + 1:stride,
                              dx:dx + stride * (ow - 1) + 1:stride])
    patches = jnp.stack(cols, axis=2)                       # (N, C, k*k, OH, OW)
    patches = patches.transpose(0, 3, 4, 1, 2).reshape(n * oh * ow, c * k * k)
    return patches, oh, ow


def conv_relu_bn(x, w, b, gamma, beta, mean, var, *, k, stride, pad):
    """Conv2d(k, stride, pad) -> ReLU -> BatchNorm2d (eval mode). NCHW."""
    n = x.shape[0]
    cout = w.shape[0]
    patches, oh, ow = im2col(x, k, stride, pad)             # (N*OH*OW, Cin*k*k)
    wmat = w.reshape(cout, -1).T                            # (Cin*k*k, Cout)
    scale = gamma / jnp.sqrt(var + BN_EPS)
    shift = beta - mean * scale
    y = fused_linear(patches, wmat, b, scale, shift, relu=True)
    return y.reshape(n, oh, ow, cout).transpose(0, 3, 1, 2)


def maxpool3x3(x, stride):
    """MaxPool2d(kernel_size=3, stride=stride, padding=1), XLA-fused max chain."""
    n, c, h, w = x.shape
    oh = (h + 2 - 3) // stride + 1
    ow = (w + 2 - 3) // stride + 1
    xp = jnp.pad(x, ((0, 0), (0, 0), (1, 1), (1, 1)),
                 constant_values=-jnp.inf)
    out = None
    for dy in range(3):
        for dx in range(3):
            win = xp[:, :, dy:dy + stride * (oh - 1) + 1:stride,
                        dx:dx + stride * (ow - 1) + 1:stride]
            out = win if out is None else jnp.maximum(out, win)
    return out


def _roi_bilinear_weights(boxes, out_size, spatial_scale, h, w, sampling_ratio=2):
    """Per-box separable bilinear+avg-pool weights built with vectorized
    compares only (no gathers).  Returns (N*out_size*out_size, H*W) f32."""
    s = sampling_ratio
    n = boxes.shape[0]
    b = boxes.astype(jnp.float32) * spatial_scale
    x1, y1, x2, y2 = b[:, 0], b[:, 1], b[:, 2], b[:, 3]
    bin_w = jnp.maximum(x2 - x1, 1.0) / out_size
    bin_h = jnp.maximum(y2 - y1, 1.0) / out_size
    i = jnp.arange(out_size * s, dtype=jnp.float32)
    ys = jnp.clip(y1[:, None] + (i[None, :] + 0.5) * bin_h[:, None] / s,
                  0.0, h - 1.0)
    xs = jnp.clip(x1[:, None] + (i[None, :] + 0.5) * bin_w[:, None] / s,
                  0.0, w - 1.0)

    def axis_w(coords, size):
        c0 = jnp.floor(coords)
        frac = coords - c0
        c0i = c0.astype(jnp.int32)
        c1i = jnp.minimum(c0i + 1, size - 1)
        grid = jnp.arange(size, dtype=jnp.int32)[None, None, :]
        w0 = (grid == c0i[:, :, None]).astype(jnp.float32) * (1.0 - frac)[:, :, None]
        w1 = (grid == c1i[:, :, None]).astype(jnp.float32) * frac[:, :, None]
        # average the s sub-samples of each output bin (separable)
        return (w0 + w1).reshape(n, out_size, s, size).mean(axis=2)

    wy = axis_w(ys, h)                                       # (N, out, H)
    wx = axis_w(xs, w)                                       # (N, out, W)
    wfull = wy[:, :, None, :, None] * wx[:, None, :, None, :]  # (N,out,out,H,W)
    return wfull.reshape(n * out_size * out_size, h * w)


def roi_align(feat, boxes, out_size, spatial_scale, sampling_ratio=2):
    """Simplified single-level ROIAlign as a dense-weight MXU matmul.
    feat: (C, H, W), boxes: (N, 4) xyxy -> (N, C, out, out)."""
    c, h, w = feat.shape
    n = boxes.shape[0]
    weights = _roi_bilinear_weights(boxes, out_size, spatial_scale, h, w,
                                    sampling_ratio)          # (N*out*out, H*W)
    feat_flat = feat.reshape(c, h * w).T                     # (H*W, C)
    pooled = fused_linear(weights, feat_flat, relu=False)    # (N*out*out, C)
    return pooled.reshape(n, out_size, out_size, c).transpose(0, 3, 1, 2)


# ------------------------------ forward pass ---------------------------------
def relation_feature_extractor_forward(x, boxes, rel_pair_idx, params):
    num_rel = rel_pair_idx.shape[0]
    head_boxes = boxes[rel_pair_idx[:, 0]]
    tail_boxes = boxes[rel_pair_idx[:, 1]]

    # boxlist_union
    union_boxes = jnp.concatenate(
        [jnp.minimum(head_boxes[:, :2], tail_boxes[:, :2]),
         jnp.maximum(head_boxes[:, 2:], tail_boxes[:, 2:])], axis=1)

    # resize head/tail boxes to (rect_size, rect_size) coordinates
    iw, ih = IMG_SIZE
    resize = jnp.array([RECT_SIZE / iw, RECT_SIZE / ih,
                        RECT_SIZE / iw, RECT_SIZE / ih], jnp.float32)
    hb = head_boxes * resize
    tb = tail_boxes * resize
    hbounds = jnp.stack([jnp.floor(hb[:, 0]), jnp.floor(hb[:, 1]),
                         jnp.ceil(hb[:, 2]), jnp.ceil(hb[:, 3])], axis=1)
    tbounds = jnp.stack([jnp.floor(tb[:, 0]), jnp.floor(tb[:, 1]),
                         jnp.ceil(tb[:, 2]), jnp.ceil(tb[:, 3])], axis=1)

    head_rect, tail_rect = rect_masks(hbounds, tbounds)             # (N, R, R)
    union_rect_inputs = jnp.stack([head_rect, tail_rect], axis=1)   # (N, 2, R, R)

    # rect_conv: Conv7x7/2 -> ReLU -> BN -> MaxPool3x3/2 -> Conv3x3/1 -> ReLU -> BN
    h = conv_relu_bn(union_rect_inputs,
                     params["conv1_w"], params["conv1_b"],
                     params["bn1_g"], params["bn1_b"],
                     params["bn1_m"], params["bn1_v"],
                     k=7, stride=2, pad=3)
    h = maxpool3x3(h, stride=2)
    union_rect_features = conv_relu_bn(
        h, params["conv2_w"], params["conv2_b"],
        params["bn2_g"], params["bn2_b"], params["bn2_m"], params["bn2_v"],
        k=3, stride=1, pad=1)                                       # (N, C, res, res)

    # feature_extractor.pooler (single level ROIAlign)
    spatial_scale = FEAT_HW / iw
    union_vis_features = roi_align(x[0], union_boxes, RESOLUTION, spatial_scale)

    # union_features = vis + rect ; forward_without_pool = fc6->relu->fc7->relu
    vis_flat = union_vis_features.reshape(num_rel, -1)
    rect_flat = union_rect_features.reshape(num_rel, -1)
    out = mlp_tail(vis_flat, rect_flat,
                   params["fc6_w"].T, params["fc6_b"],
                   params["fc7_w"].T, params["fc7_b"])
    return out


# ------------------------------ parameter init -------------------------------
def init_params(key):
    mid = IN_CHANNELS // 2
    flat_in = IN_CHANNELS * RESOLUTION * RESOLUTION
    ks = jax.random.split(key, 6)
    p = {
        "conv1_w": 0.05 * jax.random.normal(ks[0], (mid, 2, 7, 7), jnp.float32),
        "conv1_b": jnp.zeros((mid,), jnp.float32),
        "bn1_g": jnp.ones((mid,), jnp.float32),
        "bn1_b": jnp.zeros((mid,), jnp.float32),
        "bn1_m": jnp.zeros((mid,), jnp.float32),
        "bn1_v": jnp.ones((mid,), jnp.float32),
        "conv2_w": 0.05 * jax.random.normal(ks[1], (IN_CHANNELS, mid, 3, 3), jnp.float32),
        "conv2_b": jnp.zeros((IN_CHANNELS,), jnp.float32),
        "bn2_g": jnp.ones((IN_CHANNELS,), jnp.float32),
        "bn2_b": jnp.zeros((IN_CHANNELS,), jnp.float32),
        "bn2_m": jnp.zeros((IN_CHANNELS,), jnp.float32),
        "bn2_v": jnp.ones((IN_CHANNELS,), jnp.float32),
        "fc6_w": 0.02 * jax.random.normal(ks[2], (MLP_DIM, flat_in), jnp.float32),
        "fc6_b": jnp.zeros((MLP_DIM,), jnp.float32),
        "fc7_w": 0.02 * jax.random.normal(ks[3], (MLP_DIM, MLP_DIM), jnp.float32),
        "fc7_b": jnp.zeros((MLP_DIM,), jnp.float32),
    }
    return p


# ------------------------------------ main ------------------------------------
if __name__ == "__main__":
    key = jax.random.PRNGKey(0)
    ks = jax.random.split(key, 6)

    # single FPN level feature map, NCHW
    x = jax.random.normal(ks[0], (1, IN_CHANNELS, FEAT_HW, FEAT_HW), jnp.float32)

    # deterministic object boxes (xyxy, image coordinates) and relation pairs
    xy1 = jax.random.uniform(ks[1], (NUM_OBJ, 2), minval=0.0, maxval=40.0)
    wh = jax.random.uniform(ks[2], (NUM_OBJ, 2), minval=8.0, maxval=24.0)
    boxes = jnp.concatenate([xy1, jnp.minimum(xy1 + wh, IMG_SIZE[0] - 1.0)], axis=1)
    rel_pair_idx = jax.random.randint(ks[3], (NUM_REL, 2), 0, NUM_OBJ)

    params = init_params(ks[4])

    fwd = jax.jit(relation_feature_extractor_forward)
    out = fwd(x, boxes, rel_pair_idx, params)
    out = jax.block_until_ready(out)
    assert out.shape == (NUM_REL, MLP_DIM), out.shape
    assert jnp.all(jnp.isfinite(out))
    print("KERNEL_OK")
</pallas_src>

<mosaic_0001>
module attributes {stable_mosaic.version = 11 : i64} {
  func.func @_rect_mask_kernel(%arg0: memref<16x4xf32, #tpu.memory_space<vmem>>, %arg1: memref<1x256xf32, #tpu.memory_space<vmem>>, %arg2: memref<1x256xf32, #tpu.memory_space<vmem>>, %arg3: memref<16x256xf32, #tpu.memory_space<vmem>>) attributes {dimension_semantics = [], scalar_prefetch = 0 : i64, scratch_operands = 0 : i64, tpu.core_type = #tpu.core_type<tc>} {
    %c0 = arith.constant 0 : index
    %c0_0 = arith.constant 0 : index
    %0 = vector.load %arg0[%c0, %c0_0] : memref<16x4xf32, #tpu.memory_space<vmem>>, vector<16x4xf32>
    %c0_1 = arith.constant 0 : index
    %c0_2 = arith.constant 0 : index
    %1 = vector.load %arg1[%c0_1, %c0_2] : memref<1x256xf32, #tpu.memory_space<vmem>>, vector<1x256xf32>
    %c0_3 = arith.constant 0 : index
    %c0_4 = arith.constant 0 : index
    %2 = vector.load %arg2[%c0_3, %c0_4] : memref<1x256xf32, #tpu.memory_space<vmem>>, vector<1x256xf32>
    %3 = vector.extract_strided_slice %0 {offsets = [0, 0], sizes = [16, 1], strides = [1, 1]} : vector<16x4xf32> to vector<16x1xf32>
    %4 = vector.broadcast %1 : vector<1x256xf32> to vector<16x256xf32>
    %5 = vector.broadcast %3 : vector<16x1xf32> to vector<16x256xf32>
    %6 = arith.cmpf oge, %4, %5 : vector<16x256xf32>
    %7 = vector.extract_strided_slice %0 {offsets = [0, 2], sizes = [16, 1], strides = [1, 1]} : vector<16x4xf32> to vector<16x1xf32>
    %8 = vector.broadcast %1 : vector<1x256xf32> to vector<16x256xf32>
    %9 = vector.broadcast %7 : vector<16x1xf32> to vector<16x256xf32>
    %10 = arith.cmpf ole, %8, %9 : vector<16x256xf32>
    %11 = arith.andi %6, %10 : vector<16x256xi1>
    %12 = vector.extract_strided_slice %0 {offsets = [0, 1], sizes = [16, 1], strides = [1, 1]} : vector<16x4xf32> to vector<16x1xf32>
    %13 = vector.broadcast %2 : vector<1x256xf32> to vector<16x256xf32>
    %14 = vector.broadcast %12 : vector<16x1xf32> to vector<16x256xf32>
    %15 = arith.cmpf oge, %13, %14 : vector<16x256xf32>
    %16 = arith.andi %11, %15 : vector<16x256xi1>
    %17 = vector.extract_strided_slice %0 {offsets = [0, 3], sizes = [16, 1], strides = [1, 1]} : vector<16x4xf32> to vector<16x1xf32>
    %18 = vector.broadcast %2 : vector<1x256xf32> to vector<16x256xf32>
    %19 = vector.broadcast %17 : vector<16x1xf32> to vector<16x256xf32>
    %20 = arith.cmpf ole, %18, %19 : vector<16x256xf32>
    %21 = arith.andi %16, %20 : vector<16x256xi1>
    %22 = arith.extui %21 : vector<16x256xi1> to vector<16x256xi32>
    %23 = arith.sitofp %22 : vector<16x256xi32> to vector<16x256xf32>
    %c0_5 = arith.constant 0 : index
    %c0_6 = arith.constant 0 : index
    %24 = vector.load %arg3[%c0_5, %c0_6] : memref<16x256xf32, #tpu.memory_space<vmem>>, vector<16x256xf32>
    tpu.vector_store %arg3[%c0_5, %c0_6], %23 {strides = array<i32>} : memref<16x256xf32, #tpu.memory_space<vmem>>, vector<16x256xf32>,
    return
  }
}

module attributes {stable_mosaic.version = 11 : i64} {
  func.func @_fused_matmul_kernel(%arg0: memref<512x128xbf16, #tpu.memory_space<vmem>>, %arg1: memref<128x128xbf16, #tpu.memory_space<vmem>>, %arg2: memref<1x128xf32, #tpu.memory_space<vmem>>, %arg3: memref<1x128xf32, #tpu.memory_space<vmem>>, %arg4: memref<1x128xf32, #tpu.memory_space<vmem>>, %arg5: memref<512x128xf32, #tpu.memory_space<vmem>>) attributes {dimension_semantics = [], scalar_prefetch = 0 : i64, scratch_operands = 0 : i64, tpu.core_type = #tpu.core_type<tc>} {
    %c0 = arith.constant 0 : index
    %c0_0 = arith.constant 0 : index
    %0 = vector.load %arg0[%c0, %c0_0] : memref<512x128xbf16, #tpu.memory_space<vmem>>, vector<512x128xbf16>
    %c0_1 = arith.constant 0 : index
    %c0_2 = arith.constant 0 : index
    %1 = vector.load %arg1[%c0_1, %c0_2] : memref<128x128xbf16, #tpu.memory_space<vmem>>, vector<128x128xbf16>
    %cst = arith.constant dense<0.000000e+00> : vector<512x128xf32>
    %2 = tpu.matmul %0, %1, %cst {dimension_numbers = #tpu.dot_dimension_numbers<[1], [0], [0], [1], [0, 0, 1, 1], [], []>} : vector<512x128xbf16>, vector<128x128xbf16>, vector<512x128xf32> -> vector<512x128xf32>
    %c0_3 = arith.constant 0 : index
    %c0_4 = arith.constant 0 : index
    %3 = vector.load %arg2[%c0_3, %c0_4] : memref<1x128xf32, #tpu.memory_space<vmem>>, vector<1x128xf32>
    %4 = vector.broadcast %3 : vector<1x128xf32> to vector<512x128xf32>
    %5 = arith.addf %2, %4 : vector<512x128xf32>
    %cst_5 = arith.constant 0.000000e+00 : f32
    %6 = vector.broadcast %cst_5 : f32 to vector<512x128xf32>
    %7 = arith.maximumf %5, %6 : vector<512x128xf32>
    %c0_6 = arith.constant 0 : index
    %c0_7 = arith.constant 0 : index
    %8 = vector.load %arg3[%c0_6, %c0_7] : memref<1x128xf32, #tpu.memory_space<vmem>>, vector<1x128xf32>
    %9 = vector.broadcast %8 : vector<1x128xf32> to vector<512x128xf32>
    %10 = arith.mulf %7, %9 : vector<512x128xf32>
    %c0_8 = arith.constant 0 : index
    %c0_9 = arith.constant 0 : index
    %11 = vector.load %arg4[%c0_8, %c0_9] : memref<1x128xf32, #tpu.memory_space<vmem>>, vector<1x128xf32>
    %12 = vector.broadcast %11 : vector<1x128xf32> to vector<512x128xf32>
    %13 = arith.addf %10, %12 : vector<512x128xf32>
    %c0_10 = arith.constant 0 : index
    %c0_11 = arith.constant 0 : index
    %14 = vector.load %arg5[%c0_10, %c0_11] : memref<512x128xf32, #tpu.memory_space<vmem>>, vector<512x128xf32>
    tpu.vector_store %arg5[%c0_10, %c0_11], %13 {strides = array<i32>} : memref<512x128xf32, #tpu.memory_space<vmem>>, vector<512x128xf32>,
    return
  }
}

module attributes {stable_mosaic.version = 11 : i64} {
  func.func @_fused_matmul_kernel(%arg0: memref<128x128xbf16, #tpu.memory_space<vmem>>, %arg1: memref<128x128xbf16, #tpu.memory_space<vmem>>, %arg2: memref<1x128xf32, #tpu.memory_space<vmem>>, %arg3: memref<1x128xf32, #tpu.memory_space<vmem>>, %arg4: memref<1x128xf32, #tpu.memory_space<vmem>>, %arg5: memref<128x128xf32, #tpu.memory_space<vmem>>) attributes {dimension_semantics = [], scalar_prefetch = 0 : i64, scratch_operands = 0 : i64, tpu.core_type = #tpu.core_type<tc>} {
    %c0 = arith.constant 0 : index
    %c0_0 = arith.constant 0 : index
    %0 = vector.load %arg0[%c0, %c0_0] : memref<128x128xbf16, #tpu.memory_space<vmem>>, vector<128x128xbf16>
    %c0_1 = arith.constant 0 : index
    %c0_2 = arith.constant 0 : index
    %1 = vector.load %arg1[%c0_1, %c0_2] : memref<128x128xbf16, #tpu.memory_space<vmem>>, vector<128x128xbf16>
    %cst = arith.constant dense<0.000000e+00> : vector<128x128xf32>
    %2 = tpu.matmul %0, %1, %cst {dimension_numbers = #tpu.dot_dimension_numbers<[1], [0], [0], [1], [0, 0, 1, 1], [], []>} : vector<128x128xbf16>, vector<128x128xbf16>, vector<128x128xf32> -> vector<128x128xf32>
    %c0_3 = arith.constant 0 : index
    %c0_4 = arith.constant 0 : index
    %3 = vector.load %arg2[%c0_3, %c0_4] : memref<1x128xf32, #tpu.memory_space<vmem>>, vector<1x128xf32>
    %4 = vector.broadcast %3 : vector<1x128xf32> to vector<128x128xf32>
    %5 = arith.addf %2, %4 : vector<128x128xf32>
    %cst_5 = arith.constant 0.000000e+00 : f32
    %6 = vector.broadcast %cst_5 : f32 to vector<128x128xf32>
    %7 = arith.maximumf %5, %6 : vector<128x128xf32>
    %c0_6 = arith.constant 0 : index
    %c0_7 = arith.constant 0 : index
    %8 = vector.load %arg3[%c0_6, %c0_7] : memref<1x128xf32, #tpu.memory_space<vmem>>, vector<1x128xf32>
    %9 = vector.broadcast %8 : vector<1x128xf32> to vector<128x128xf32>
    %10 = arith.mulf %7, %9 : vector<128x128xf32>
    %c0_8 = arith.constant 0 : index
    %c0_9 = arith.constant 0 : index
    %11 = vector.load %arg4[%c0_8, %c0_9] : memref<1x128xf32, #tpu.memory_space<vmem>>, vector<1x128xf32>
    %12 = vector.broadcast %11 : vector<1x128xf32> to vector<128x128xf32>
    %13 = arith.addf %10, %12 : vector<128x128xf32>
    %c0_10 = arith.constant 0 : index
    %c0_11 = arith.constant 0 : index
    %14 = vector.load %arg5[%c0_10, %c0_11] : memref<128x128xf32, #tpu.memory_space<vmem>>, vector<128x128xf32>
    tpu.vector_store %arg5[%c0_10, %c0_11], %13 {strides = array<i32>} : memref<128x128xf32, #tpu.memory_space<vmem>>, vector<128x128xf32>,
    return
  }
}

module attributes {stable_mosaic.version = 11 : i64} {
  func.func @_fused_matmul_kernel(%arg0: memref<128x1024xbf16, #tpu.memory_space<vmem>>, %arg1: memref<1024x128xbf16, #tpu.memory_space<vmem>>, %arg2: memref<1x128xf32, #tpu.memory_space<vmem>>, %arg3: memref<1x128xf32, #tpu.memory_space<vmem>>, %arg4: memref<1x128xf32, #tpu.memory_space<vmem>>, %arg5: memref<128x128xf32, #tpu.memory_space<vmem>>) attributes {dimension_semantics = [], scalar_prefetch = 0 : i64, scratch_operands = 0 : i64, tpu.core_type = #tpu.core_type<tc>} {
    %c0 = arith.constant 0 : index
    %c0_0 = arith.constant 0 : index
    %0 = vector.load %arg0[%c0, %c0_0] : memref<128x1024xbf16, #tpu.memory_space<vmem>>, vector<128x1024xbf16>
    %c0_1 = arith.constant 0 : index
    %c0_2 = arith.constant 0 : index
    %1 = vector.load %arg1[%c0_1, %c0_2] : memref<1024x128xbf16, #tpu.memory_space<vmem>>, vector<1024x128xbf16>
    %cst = arith.constant dense<0.000000e+00> : vector<128x128xf32>
    %2 = tpu.matmul %0, %1, %cst {dimension_numbers = #tpu.dot_dimension_numbers<[1], [0], [0], [1], [0, 0, 1, 1], [], []>} : vector<128x1024xbf16>, vector<1024x128xbf16>, vector<128x128xf32> -> vector<128x128xf32>
    %c0_3 = arith.constant 0 : index
    %c0_4 = arith.constant 0 : index
    %3 = vector.load %arg2[%c0_3, %c0_4] : memref<1x128xf32, #tpu.memory_space<vmem>>, vector<1x128xf32>
    %4 = vector.broadcast %3 : vector<1x128xf32> to vector<128x128xf32>
    %5 = arith.addf %2, %4 : vector<128x128xf32>
    %c0_5 = arith.constant 0 : index
    %c0_6 = arith.constant 0 : index
    %6 = vector.load %arg3[%c0_5, %c0_6] : memref<1x128xf32, #tpu.memory_space<vmem>>, vector<1x128xf32>
    %7 = vector.broadcast %6 : vector<1x128xf32> to vector<128x128xf32>
    %8 = arith.mulf %5, %7 : vector<128x128xf32>
    %c0_7 = arith.constant 0 : index
    %c0_8 = arith.constant 0 : index
    %9 = vector.load %arg4[%c0_7, %c0_8] : memref<1x128xf32, #tpu.memory_space<vmem>>, vector<1x128xf32>
    %10 = vector.broadcast %9 : vector<1x128xf32> to vector<128x128xf32>
    %11 = arith.addf %8, %10 : vector<128x128xf32>
    %c0_9 = arith.constant 0 : index
    %c0_10 = arith.constant 0 : index
    %12 = vector.load %arg5[%c0_9, %c0_10] : memref<128x128xf32, #tpu.memory_space<vmem>>, vector<128x128xf32>
    tpu.vector_store %arg5[%c0_9, %c0_10], %11 {strides = array<i32>} : memref<128x128xf32, #tpu.memory_space<vmem>>, vector<128x128xf32>,
    return
  }
}

module attributes {stable_mosaic.version = 11 : i64} {
  func.func @_mlp_tail_kernel(%arg0: memref<8x256xf32, #tpu.memory_space<vmem>>, %arg1: memref<8x256xf32, #tpu.memory_space<vmem>>, %arg2: memref<256x128xbf16, #tpu.memory_space<vmem>>, %arg3: memref<1x128xf32, #tpu.memory_space<vmem>>, %arg4: memref<128x128xbf16, #tpu.memory_space<vmem>>, %arg5: memref<1x128xf32, #tpu.memory_space<vmem>>, %arg6: memref<8x128xf32, #tpu.memory_space<vmem>>) attributes {dimension_semantics = [], scalar_prefetch = 0 : i64, scratch_operands = 0 : i64, tpu.core_type = #tpu.core_type<tc>} {
    %c0 = arith.constant 0 : index
    %c0_0 = arith.constant 0 : index
    %0 = vector.load %arg0[%c0, %c0_0] : memref<8x256xf32, #tpu.memory_space<vmem>>, vector<8x256xf32>
    %c0_1 = arith.constant 0 : index
    %c0_2 = arith.constant 0 : index
    %1 = vector.load %arg1[%c0_1, %c0_2] : memref<8x256xf32, #tpu.memory_space<vmem>>, vector<8x256xf32>
    %2 = arith.addf %0, %1 : vector<8x256xf32>
    %3 = arith.truncf %2 : vector<8x256xf32> to vector<8x256xbf16>
    %c0_3 = arith.constant 0 : index
    %c0_4 = arith.constant 0 : index
    %4 = vector.load %arg2[%c0_3, %c0_4] : memref<256x128xbf16, #tpu.memory_space<vmem>>, vector<256x128xbf16>
    %cst = arith.constant dense<0.000000e+00> : vector<8x128xf32>
    %5 = tpu.matmul %3, %4, %cst {dimension_numbers = #tpu.dot_dimension_numbers<[1], [0], [0], [1], [0, 0, 1, 1], [], []>} : vector<8x256xbf16>, vector<256x128xbf16>, vector<8x128xf32> -> vector<8x128xf32>
    %c0_5 = arith.constant 0 : index
    %c0_6 = arith.constant 0 : index
    %6 = vector.load %arg3[%c0_5, %c0_6] : memref<1x128xf32, #tpu.memory_space<vmem>>, vector<1x128xf32>
    %7 = vector.broadcast %6 : vector<1x128xf32> to vector<8x128xf32>
    %8 = arith.addf %5, %7 : vector<8x128xf32>
    %cst_7 = arith.constant 0.000000e+00 : f32
    %9 = vector.broadcast %cst_7 : f32 to vector<8x128xf32>
    %10 = arith.maximumf %8, %9 : vector<8x128xf32>
    %11 = arith.truncf %10 : vector<8x128xf32> to vector<8x128xbf16>
    %c0_8 = arith.constant 0 : index
    %c0_9 = arith.constant 0 : index
    %12 = vector.load %arg4[%c0_8, %c0_9] : memref<128x128xbf16, #tpu.memory_space<vmem>>, vector<128x128xbf16>
    %cst_10 = arith.constant dense<0.000000e+00> : vector<8x128xf32>
    %13 = tpu.matmul %11, %12, %cst_10 {dimension_numbers = #tpu.dot_dimension_numbers<[1], [0], [0], [1], [0, 0, 1, 1], [], []>} : vector<8x128xbf16>, vector<128x128xbf16>, vector<8x128xf32> -> vector<8x128xf32>
    %c0_11 = arith.constant 0 : index
    %c0_12 = arith.constant 0 : index
    %14 = vector.load %arg5[%c0_11, %c0_12] : memref<1x128xf32, #tpu.memory_space<vmem>>, vector<1x128xf32>
    %15 = vector.broadcast %14 : vector<1x128xf32> to vector<8x128xf32>
    %16 = arith.addf %13, %15 : vector<8x128xf32>
    %cst_13 = arith.constant 0.000000e+00 : f32
    %17 = vector.broadcast %cst_13 : f32 to vector<8x128xf32>
    %18 = arith.maximumf %16, %17 : vector<8x128xf32>
    %c0_14 = arith.constant 0 : index
    %c0_15 = arith.constant 0 : index
    %19 = vector.load %arg6[%c0_14, %c0_15] : memref<8x128xf32, #tpu.memory_space<vmem>>, vector<8x128xf32>
    tpu.vector_store %arg6[%c0_14, %c0_15], %18 {strides = array<i32>} : memref<8x128xf32, #tpu.memory_space<vmem>>, vector<8x128xf32>,
    return
  }
}

</mosaic_0001>

<bundles_post_ra>
// kernel: squeeze.27
= control target key start
LH: loop header
LB: loop body
LE: loop exit
PB: predicated region body
PF: predicated region fallthrough
CT: control target
= control target key end

     0   :  { %vm204_vm0 = vcmask 982016   ;;  %vm34_vm1 = vcmask 121856   ;;  %s434_s8 = smov 113   ;;  %s435_s9 = smov 106   ;;  %vm208_vm2 = vcmask 64512   ;;  %vm217_vm3 = vcmask 121920   ;;  %s540_s0 = inlined_call_operand.vmem [shape: bf16[8,225], index: 0, kind: input, shape index: {}]   ;;  %s541_s1 = inlined_call_operand.vmem [shape: bf16[8,1,15,15], index: 1, kind: output, shape index: {}]  }
   0x1   :  { %v369_v0 = vld [vmem:[%s540_s0] sm:$0xff]   ;;  %s433_s0 = smov 121   ;;  %s436_s10 = smov 8  }
   0x2   :  { %v371_v1 = vunpack.c.h.bf16 %v369_v0  ;;  %v370_v2 = vunpack.c.l.bf16 %v369_v0  ;;  %s437_s11 = smov 91   ;;  %s438_s12 = smov 98  }
   0x3   :  { %s439_s13 = smov 76   ;;  %s440_s14 = smov 83  }
   0x4   :  { %41 = vrot.lane.b32.xlu0 %v371_v1, %s433_s0  ;;  %53 = vrot.lane.b32.xlu1 %v370_v2, %s434_s8  ;;  %38 = vst.msk [vmem:[#allocation0] ss:$16 sm:$0xc0] %vm34_vm1, %v370_v2   ;;  %35 = vst.msk [vmem:[#allocation0] ss:$16 sm:$0x3] %vm34_vm1, %v370_v2   ;;  %v205_v3 = vsel %vm204_vm0, %v371_v1, %v370_v2 }
   0x5   :  { %36 = vst.msk [vmem:[#allocation0] ss:$16 sm:$0xc] %vm34_vm1, %v370_v2   ;;  %37 = vst.msk [vmem:[#allocation0] ss:$16 sm:$0x30] %vm34_vm1, %v370_v2  }
   0x6   :  { %s441_s15 = smov 61   ;;  %s442_s16 = smov 68  }
   0x7   :  { %s443_s17 = smov 46   ;;  %s444_s18 = smov 53  }
   0x8   :  { %66 = vrot.lane.b32.xlu1 %v371_v1, %s435_s9  ;;  %206 = vrot.lane.b32.xlu0 %v205_v3, %s436_s10  ;;  %s445_s19 = smov 23   ;;  %s446_s20 = smov 38  }
   0xc   :  { %91 = vrot.lane.b32.xlu1 %v371_v1, %s437_s11  ;;  %78 = vrot.lane.b32.xlu0 %v370_v2, %s438_s12 }
  0x10   :  { %116 = vrot.lane.b32.xlu1 %v371_v1, %s439_s13  ;;  %103 = vrot.lane.b32.xlu0 %v370_v2, %s440_s14 }
  0x14   :  { %141 = vrot.lane.b32.xlu1 %v371_v1, %s441_s15  ;;  %128 = vrot.lane.b32.xlu0 %v370_v2, %s442_s16 }
  0x18   :  { %166 = vrot.lane.b32.xlu1 %v371_v1, %s443_s17  ;;  %153 = vrot.lane.b32.xlu0 %v370_v2, %s444_s18 }
  0x1c   :  { %190 = vrot.lane.b32.xlu1 %v370_v2, %s445_s19  ;;  %178 = vrot.lane.b32.xlu0 %v370_v2, %s446_s20 }
  0x76   :  { %v42_v4 = vpop.permute.xlu0 %41   ;;  %v54_v5 = vpop.permute.xlu1 %53  }
  0x77   :  { %45 = vst.msk [vmem:[#allocation0 + $0x9] ss:$16 sm:$0x3] %vm34_vm1, %v42_v4   ;;  %47 = vst.msk [vmem:[#allocation0 + $0x9] ss:$16 sm:$0xc] %vm34_vm1, %v42_v4  }
  0x78   :  { %49 = vst.msk [vmem:[#allocation0 + $0x9] ss:$16 sm:$0x30] %vm34_vm1, %v42_v4   ;;  %51 = vst.msk [vmem:[#allocation0 + $0x9] ss:$16 sm:$0xc0] %vm34_vm1, %v42_v4  }
  0x79   :  { %57 = vst.msk [vmem:[#allocation0 + $0x1] ss:$16 sm:$0x3] %vm34_vm1, %v54_v5   ;;  %59 = vst.msk [vmem:[#allocation0 + $0x1] ss:$16 sm:$0xc] %vm34_vm1, %v54_v5  }
  0x7a   :  { %61 = vst.msk [vmem:[#allocation0 + $0x1] ss:$16 sm:$0x30] %vm34_vm1, %v54_v5   ;;  %63 = vst.msk [vmem:[#allocation0 + $0x1] ss:$16 sm:$0xc0] %vm34_vm1, %v54_v5   ;;  %v67_v6 = vpop.permute.xlu1 %66   ;;  %v207_v7 = vpop.permute.xlu0 %206  }
  0x7b   :  { %70 = vst.msk [vmem:[#allocation0 + $0xa] ss:$16 sm:$0x3] %vm34_vm1, %v67_v6   ;;  %72 = vst.msk [vmem:[#allocation0 + $0xa] ss:$16 sm:$0xc] %vm34_vm1, %v67_v6  }
  0x7c   :  { %74 = vst.msk [vmem:[#allocation0 + $0xa] ss:$16 sm:$0x30] %vm34_vm1, %v67_v6   ;;  %76 = vst.msk [vmem:[#allocation0 + $0xa] ss:$16 sm:$0xc0] %vm34_vm1, %v67_v6  }
  0x7d   :  { %210 = vst.msk [vmem:[#allocation0 + $0x8] ss:$16 sm:$0x3] %vm208_vm2, %v207_v7   ;;  %212 = vst.msk [vmem:[#allocation0 + $0x8] ss:$16 sm:$0xc] %vm208_vm2, %v207_v7  }
  0x7e   :  { %214 = vst.msk [vmem:[#allocation0 + $0x8] ss:$16 sm:$0x30] %vm208_vm2, %v207_v7   ;;  %216 = vst.msk [vmem:[#allocation0 + $0x8] ss:$16 sm:$0xc0] %vm208_vm2, %v207_v7   ;;  %v92_v8 = vpop.permute.xlu1 %91   ;;  %v79_v9 = vpop.permute.xlu0 %78  }
  0x7f   :  { %219 = vst.msk [vmem:[#allocation0 + $0x8] ss:$16 sm:$0x3] %vm217_vm3, %v207_v7   ;;  %221 = vst.msk [vmem:[#allocation0 + $0x8] ss:$16 sm:$0xc] %vm217_vm3, %v207_v7  }
  0x80   :  { %223 = vst.msk [vmem:[#allocation0 + $0x8] ss:$16 sm:$0x30] %vm217_vm3, %v207_v7   ;;  %225 = vst.msk [vmem:[#allocation0 + $0x8] ss:$16 sm:$0xc0] %vm217_vm3, %v207_v7  }
  0x81   :  { %95 = vst.msk [vmem:[#allocation0 + $0xb] ss:$16 sm:$0x3] %vm34_vm1, %v92_v8   ;;  %97 = vst.msk [vmem:[#allocation0 + $0xb] ss:$16 sm:$0xc] %vm34_vm1, %v92_v8  }
  0x82   :  { %99 = vst.msk [vmem:[#allocation0 + $0xb] ss:$16 sm:$0x30] %vm34_vm1, %v92_v8   ;;  %101 = vst.msk [vmem:[#allocation0 + $0xb] ss:$16 sm:$0xc0] %vm34_vm1, %v92_v8   ;;  %v117_v10 = vpop.permute.xlu1 %116   ;;  %v104_v11 = vpop.permute.xlu0 %103  }
  0x83   :  { %82 = vst.msk [vmem:[#allocation0 + $0x2] ss:$16 sm:$0x3] %vm34_vm1, %v79_v9   ;;  %84 = vst.msk [vmem:[#allocation0 + $0x2] ss:$16 sm:$0xc] %vm34_vm1, %v79_v9  }
  0x84   :  { %86 = vst.msk [vmem:[#allocation0 + $0x2] ss:$16 sm:$0x30] %vm34_vm1, %v79_v9   ;;  %88 = vst.msk [vmem:[#allocation0 + $0x2] ss:$16 sm:$0xc0] %vm34_vm1, %v79_v9  }
  0x85   :  { %120 = vst.msk [vmem:[#allocation0 + $0xc] ss:$16 sm:$0x3] %vm34_vm1, %v117_v10   ;;  %122 = vst.msk [vmem:[#allocation0 + $0xc] ss:$16 sm:$0xc] %vm34_vm1, %v117_v10  }
  0x86   :  { %124 = vst.msk [vmem:[#allocation0 + $0xc] ss:$16 sm:$0x30] %vm34_vm1, %v117_v10   ;;  %126 = vst.msk [vmem:[#allocation0 + $0xc] ss:$16 sm:$0xc0] %vm34_vm1, %v117_v10   ;;  %v142_v12 = vpop.permute.xlu1 %141   ;;  %v129_v13 = vpop.permute.xlu0 %128  }
  0x87   :  { %107 = vst.msk [vmem:[#allocation0 + $0x3] ss:$16 sm:$0x3] %vm34_vm1, %v104_v11   ;;  %109 = vst.msk [vmem:[#allocation0 + $0x3] ss:$16 sm:$0xc] %vm34_vm1, %v104_v11  }
  0x88   :  { %111 = vst.msk [vmem:[#allocation0 + $0x3] ss:$16 sm:$0x30] %vm34_vm1, %v104_v11   ;;  %113 = vst.msk [vmem:[#allocation0 + $0x3] ss:$16 sm:$0xc0] %vm34_vm1, %v104_v11  }
  0x89   :  { %145 = vst.msk [vmem:[#allocation0 + $0xd] ss:$16 sm:$0x3] %vm34_vm1, %v142_v12   ;;  %147 = vst.msk [vmem:[#allocation0 + $0xd] ss:$16 sm:$0xc] %vm34_vm1, %v142_v12  }
  0x8a   :  { %149 = vst.msk [vmem:[#allocation0 + $0xd] ss:$16 sm:$0x30] %vm34_vm1, %v142_v12   ;;  %151 = vst.msk [vmem:[#allocation0 + $0xd] ss:$16 sm:$0xc0] %vm34_vm1, %v142_v12   ;;  %v167_v14 = vpop.permute.xlu1 %166   ;;  %v154_v15 = vpop.permute.xlu0 %153  }
  0x8b   :  { %132 = vst.msk [vmem:[#allocation0 + $0x4] ss:$16 sm:$0x3] %vm34_vm1, %v129_v13   ;;  %134 = vst.msk [vmem:[#allocation0 + $0x4] ss:$16 sm:$0xc] %vm34_vm1, %v129_v13  }
  0x8c   :  { %136 = vst.msk [vmem:[#allocation0 + $0x4] ss:$16 sm:$0x30] %vm34_vm1, %v129_v13   ;;  %138 = vst.msk [vmem:[#allocation0 + $0x4] ss:$16 sm:$0xc0] %vm34_vm1, %v129_v13  }
  0x8d   :  { %170 = vst.msk [vmem:[#allocation0 + $0xe] ss:$16 sm:$0x3] %vm34_vm1, %v167_v14   ;;  %172 = vst.msk [vmem:[#allocation0 + $0xe] ss:$16 sm:$0xc] %vm34_vm1, %v167_v14  }
  0x8e   :  { %174 = vst.msk [vmem:[#allocation0 + $0xe] ss:$16 sm:$0x30] %vm34_vm1, %v167_v14   ;;  %176 = vst.msk [vmem:[#allocation0 + $0xe] ss:$16 sm:$0xc0] %vm34_vm1, %v167_v14   ;;  %v191_v16 = vpop.permute.xlu1 %190   ;;  %v179_v17 = vpop.permute.xlu0 %178  }
  0x8f   :  { %157 = vst.msk [vmem:[#allocation0 + $0x5] ss:$16 sm:$0x3] %vm34_vm1, %v154_v15   ;;  %159 = vst.msk [vmem:[#allocation0 + $0x5] ss:$16 sm:$0xc] %vm34_vm1, %v154_v15  }
  0x90   :  { %161 = vst.msk [vmem:[#allocation0 + $0x5] ss:$16 sm:$0x30] %vm34_vm1, %v154_v15   ;;  %163 = vst.msk [vmem:[#allocation0 + $0x5] ss:$16 sm:$0xc0] %vm34_vm1, %v154_v15  }
  0x91   :  { %194 = vst.msk [vmem:[#allocation0 + $0x7] ss:$16 sm:$0x3] %vm34_vm1, %v191_v16   ;;  %196 = vst.msk [vmem:[#allocation0 + $0x7] ss:$16 sm:$0xc] %vm34_vm1, %v191_v16  }
  0x92   :  { %198 = vst.msk [vmem:[#allocation0 + $0x7] ss:$16 sm:$0x30] %vm34_vm1, %v191_v16   ;;  %200 = vst.msk [vmem:[#allocation0 + $0x7] ss:$16 sm:$0xc0] %vm34_vm1, %v191_v16  }
  0x93   :  { %182 = vst.msk [vmem:[#allocation0 + $0x6] ss:$16 sm:$0x3] %vm34_vm1, %v179_v17   ;;  %184 = vst.msk [vmem:[#allocation0 + $0x6] ss:$16 sm:$0xc] %vm34_vm1, %v179_v17  }
  0x94   :  { %186 = vst.msk [vmem:[#allocation0 + $0x6] ss:$16 sm:$0x30] %vm34_vm1, %v179_v17   ;;  %188 = vst.msk [vmem:[#allocation0 + $0x6] ss:$16 sm:$0xc0] %vm34_vm1, %v179_v17  }
  0x95   :  { %v262_v18 = vld [vmem:[#allocation0 + $0x28] sm:$0xff]  ;;  %v276_v19 = vld [vmem:[#allocation0 + $0x38] sm:$0xff] }
  0x96   :  { %v290_v20 = vld [vmem:[#allocation0 + $0x48] sm:$0xff]  ;;  %v304_v21 = vld [vmem:[#allocation0 + $0x58] sm:$0xff] }
  0x97   :  { %v235_v22 = vld [vmem:[#allocation0 + $0x8] sm:$0xff]  ;;  %v248_v23 = vld [vmem:[#allocation0 + $0x18] sm:$0xff] }
  0x98   :  { %v318_v24 = vld [vmem:[#allocation0 + $0x68] sm:$0xff]  ;;  %v332_v34 = vld [vmem:[#allocation0 + $0x78] sm:$0xff] }
  0x9a   :  { %v230_v25 = vld [vmem:[#allocation0] sm:$0xff]  ;;  %v241_v26 = vld [vmem:[#allocation0 + $0x10] sm:$0xff] }
  0x9b   :  { %v255_v27 = vld [vmem:[#allocation0 + $0x20] sm:$0xff]  ;;  %v375_v28 = vpack.c.bf16 %v235_v22, %v230_v25  ;;  %v380_v29 = vpack.c.bf16 %v248_v23, %v241_v26  ;;  %v269_v31 = vld [vmem:[#allocation0 + $0x30] sm:$0xff] }
  0x9c   :  { %v385_v30 = vpack.c.bf16 %v262_v18, %v255_v27  ;;  %v283_v32 = vld [vmem:[#allocation0 + $0x40] sm:$0xff]  ;;  %v297_v33 = vld [vmem:[#allocation0 + $0x50] sm:$0xff]  ;;  %v390_v35 = vpack.c.bf16 %v276_v19, %v269_v31 }
  0x9d   :  { %v395_v36 = vpack.c.bf16 %v290_v20, %v283_v32  ;;  %v400_v37 = vpack.c.bf16 %v304_v21, %v297_v33  ;;  %v311_v38 = vld [vmem:[#allocation0 + $0x60] sm:$0xff]  ;;  %v325_v39 = vld [vmem:[#allocation0 + $0x70] sm:$0xff]  ;;  %376 = vst [vmem:[%s541_s1] sm:$0xff] %v375_v28   ;;  %412 = vst [vmem:[%s541_s1 + $0x8] sm:$0xff] %v380_v29  }
  0x9e   :  { %413 = vst [vmem:[%s541_s1 + $0x10] sm:$0xff] %v385_v30   ;;  %v405_v40 = vpack.c.bf16 %v318_v24, %v311_v38  ;;  %v410_v41 = vpack.c.bf16 %v332_v34, %v325_v39  ;;  %414 = vst [vmem:[%s541_s1 + $0x18] sm:$0xff] %v390_v35  }
  0x9f   :  { %415 = vst [vmem:[%s541_s1 + $0x20] sm:$0xff] %v395_v36   ;;  %416 = vst [vmem:[%s541_s1 + $0x28] sm:$0xff] %v400_v37  }
  0xa0   :  { %417 = vst [vmem:[%s541_s1 + $0x30] sm:$0xff] %v405_v40   ;;  %418 = vst [vmem:[%s541_s1 + $0x38] sm:$0xff] %v410_v41  }

// kernel: relation_feature_extractor_forward.5
= control target key start
LH: loop header
LB: loop body
LE: loop exit
PB: predicated region body
PF: predicated region fallthrough
CT: control target
= control target key end

     0   :  { %v133_v0 = vmov 2   ;;  %v134_v1 = vmov 0   ;;  %v135_v4 = vmov 1   ;;  %v136_v5 = vmov 3   ;;  %s182_s0 = inlined_call_operand.vmem [shape: f32[16,4], index: 0, kind: input, shape index: {}]   ;;  %s183_s1 = inlined_call_operand.vmem [shape: f32[1,256], index: 1, kind: input, shape index: {}]   ;;  %s184_s2 = inlined_call_operand.vmem [shape: f32[1,256], index: 2, kind: input, shape index: {}]   ;;  %s185_s3 = inlined_call_operand.vmem [shape: f32[16,256], index: 3, kind: output, shape index: {}]  }
   0x1   :  { %128 = vset.pattern.permute.xlu1 %v133_v0  ;;  %127 = vset.pattern.permute.xlu0 %v134_v1  ;;  %v14_v2 = vld [vmem:[%s182_s0] sm:$0xff]  ;;  %v15_v3 = vld [vmem:[%s182_s0 + $0x8] sm:$0xff]  ;;  %v19_v6 = vlaneseq  ;;  %v137_v24 = vmov 0.0  }
   0x2   :  { %44 = vperm.xlu1 %128, %v14_v2   ;;  %31 = vperm.xlu0 %127, %v14_v2   ;;  %v16_v9 = vld [vmem:[%s183_s1] sm:$0x3] }
   0x3   :  { %v20_v7 = vshrl.u32 %v19_v6, 7  ;;  %v17_v15 = vld [vmem:[%s184_s2] sm:$0x3] }
   0x5   :  { %v21_v8 = vsub.s32 0, %v20_v7  ;;  %v25_v10 = vsub.s32 1, %v20_v7 }
   0x6   :  { %48 = vperm.xlu1 %128, %v15_v3   ;;  %36 = vperm.xlu0 %127, %v15_v3  }
   0x7   :  { %v22_v13 = vrot.slane %v16_v9, %v21_v8  ;;  %v26_v14 = vrot.slane %v16_v9, %v25_v10  ;;  %v63_v18 = vrot.slane %v17_v15, %v21_v8  ;;  %v67_v19 = vrot.slane %v17_v15, %v25_v10 }
   0xa   :  { %130 = vset.pattern.permute.xlu1 %v135_v4  ;;  %129 = vset.pattern.permute.xlu0 %v135_v4 }
   0xb   :  { %75 = vperm.xlu1 %130, %v15_v3   ;;  %71 = vperm.xlu0 %129, %v14_v2  }
   0xf   :  { %131 = vset.pattern.permute.xlu1 %v136_v5  ;;  %132 = vset.pattern.permute.xlu0 %v136_v5 }
  0x10   :  { %87 = vperm.xlu1 %131, %v14_v2   ;;  %91 = vperm.xlu0 %132, %v15_v3  }
  0x81   :  { %v45_v11 = vpop.permute.xlu1 %44  ;;  %v32_v12 = vpop.permute.xlu0 %31 }
  0x82   :  { %vm51_vm0 = vcmp.le.f32.partialorder %v22_v13, %v45_v11  ;;  %vm39_vm1 = vcmp.ge.f32.partialorder %v22_v13, %v32_v12  ;;  %vm52_vm2 = vcmp.le.f32.partialorder %v26_v14, %v45_v11  ;;  %vm40_vm3 = vcmp.ge.f32.partialorder %v26_v14, %v32_v12 }
  0x83   :  { %vm55_vm6 = vmand %vm39_vm1, %vm51_vm0 }
  0x84   :  { %vm56_vm9 = vmand %vm40_vm3, %vm52_vm2 }
  0x85   :  { %v49_v16 = vpop.permute.xlu1 %48  ;;  %v37_v17 = vpop.permute.xlu0 %36 }
  0x86   :  { %vm53_vm4 = vcmp.le.f32.partialorder %v22_v13, %v49_v16  ;;  %vm41_vm5 = vcmp.ge.f32.partialorder %v22_v13, %v37_v17  ;;  %vm54_vm7 = vcmp.le.f32.partialorder %v26_v14, %v49_v16  ;;  %vm42_vm8 = vcmp.ge.f32.partialorder %v26_v14, %v37_v17 }
  0x87   :  { %vm57_vm10 = vmand %vm41_vm5, %vm53_vm4 }
  0x88   :  { %vm58_vm13 = vmand %vm42_vm8, %vm54_vm7 }
  0x8a   :  { %v76_v20 = vpop.permute.xlu1 %75  ;;  %v72_v21 = vpop.permute.xlu0 %71 }
  0x8b   :  { %vm78_vm11 = vcmp.ge.f32.partialorder %v63_v18, %v72_v21  ;;  %vm79_vm12 = vcmp.ge.f32.partialorder %v67_v19, %v72_v21  ;;  %vm80_vm14 = vcmp.ge.f32.partialorder %v63_v18, %v76_v20  ;;  %vm81_vm15 = vcmp.ge.f32.partialorder %v67_v19, %v76_v20 }
  0x8c   :  { %vm82_vm0 = vmand %vm55_vm6, %vm78_vm11 }
  0x8d   :  { %vm83_vm1 = vmand %vm56_vm9, %vm79_vm12 }
  0x8e   :  { %vm84_vm2 = vmand %vm57_vm10, %vm80_vm14 }
  0x8f   :  { %v88_v22 = vpop.permute.xlu1 %87  ;;  %v92_v23 = vpop.permute.xlu0 %91  ;;  %vm85_vm5 = vmand %vm58_vm13, %vm81_vm15 }
  0x90   :  { %vm94_vm3 = vcmp.le.f32.partialorder %v63_v18, %v88_v22  ;;  %vm95_vm4 = vcmp.le.f32.partialorder %v67_v19, %v88_v22  ;;  %vm96_vm7 = vcmp.le.f32.partialorder %v63_v18, %v92_v23  ;;  %vm97_vm6 = vcmp.le.f32.partialorder %v67_v19, %v92_v23 }
  0x91   :  { %vm98_vm8 = vmand %vm82_vm0, %vm94_vm3 }
  0x92   :  { %vm99_vm11 = vmand %vm83_vm1, %vm95_vm4  ;;  %v118_v25 = vsel %vm98_vm8, 1.0, %v137_v24 }
  0x93   :  { %v119_v26 = vsel %vm99_vm11, 1.0, %v137_v24  ;;  %110 = vst [vmem:[%s185_s3] sm:$0xff] %v118_v25  ;;  %vm100_vm9 = vmand %vm84_vm2, %vm96_vm7 }
  0x94   :  { %111 = vst [vmem:[%s185_s3 + $0x8] sm:$0xff] %v119_v26  ;;  %vm101_vm10 = vmand %vm85_vm5, %vm97_vm6  ;;  %v120_v27 = vsel %vm100_vm9, 1.0, %v137_v24 }
  0x95   :  { %v121_v28 = vsel %vm101_vm10, 1.0, %v137_v24  ;;  %112 = vst [vmem:[%s185_s3 + $0x10] sm:$0xff] %v120_v27 }
  0x96   :  { %113 = vst [vmem:[%s185_s3 + $0x18] sm:$0xff] %v121_v28 }

// kernel: relation_feature_extractor_forward.6
= control target key start
LH: loop header
LB: loop body
LE: loop exit
PB: predicated region body
PF: predicated region fallthrough
CT: control target
= control target key end

     0   :  { %s1679_s1 = inlined_call_operand.vmem [shape: bf16[128,128], index: 1, kind: input, shape index: {}]   ;;  %s1680_s0 = inlined_call_operand.vmem [shape: bf16[512,128], index: 0, kind: input, shape index: {}]   ;;  %s1681_s2 = inlined_call_operand.vmem [shape: f32[1,128], index: 2, kind: input, shape index: {}]   ;;  %s1682_s3 = inlined_call_operand.vmem [shape: f32[1,128], index: 3, kind: input, shape index: {}]   ;;  %s1683_s4 = inlined_call_operand.vmem [shape: f32[1,128], index: 4, kind: input, shape index: {}]   ;;  %s1684_s5 = inlined_call_operand.vmem [shape: f32[512,128], index: 5, kind: output, shape index: {}]  }
   0x1   :  { %v1090_v0 = vld [vmem:[%s1679_s1] sm:$0xff]   ;;  %v1091_v1 = vld [vmem:[%s1679_s1 + $0x8] sm:$0xff]   ;;  %v1092_v2 = vld [vmem:[%s1679_s1 + $0x10] sm:$0xff]  }
   0x2   :  { %994 = vmatprep.subr.bf16.mxu0 %v1090_v0  ;;  %1074 = vmatprep.subr.bf16.mxu1 %v1090_v0  ;;  %v1093_v3 = vld [vmem:[%s1679_s1 + $0x18] sm:$0xff]   ;;  %v1098_v4 = vld [vmem:[%s1680_s0] sm:$0xff]   ;;  %v1095_v7 = vld [vmem:[%s1679_s1 + $0x28] sm:$0xff]  }
   0x3   :  { %995 = vmatpush3.bf16.msra.mxu0 %v1090_v0  ;;  %1082 = vmatpush3.bf16.msra.mxu1 %v1090_v0  ;;  %v1099_v5 = vld [vmem:[%s1680_s0 + $0x80] sm:$0xff]   ;;  %v1096_v8 = vld [vmem:[%s1679_s1 + $0x30] sm:$0xff]   ;;  %v1097_v9 = vld [vmem:[%s1679_s1 + $0x38] sm:$0xff]  }
   0x4   :  { %996 = vmatprep.subr.bf16.mxu0 %v1091_v1  ;;  %1075 = vmatprep.subr.bf16.mxu1 %v1091_v1  ;;  %v1094_v6 = vld [vmem:[%s1679_s1 + $0x20] sm:$0xff]   ;;  %v1100_v10 = vld [vmem:[%s1680_s0 + $0x8] sm:$0xff]   ;;  %v1102_v12 = vld [vmem:[%s1680_s0 + $0x10] sm:$0xff]  }
   0x5   :  { %1010 = vmatprep.mubr.bf16.mxu0 %v1098_v4  ;;  %1042 = vmatprep.mubr.bf16.mxu1 %v1099_v5  ;;  %v1101_v11 = vld [vmem:[%s1680_s0 + $0x88] sm:$0xff]   ;;  %v1103_v13 = vld [vmem:[%s1680_s0 + $0x90] sm:$0xff]   ;;  %v1104_v14 = vld [vmem:[%s1680_s0 + $0x18] sm:$0xff]  }
   0x6   :  { %v1105_v15 = vld [vmem:[%s1680_s0 + $0x98] sm:$0xff]   ;;  %v1106_v16 = vld [vmem:[%s1680_s0 + $0x20] sm:$0xff]   ;;  %v1108_v18 = vld [vmem:[%s1680_s0 + $0x28] sm:$0xff]  }
   0x7   :  { %997 = vmatpush3.bf16.msra.mxu0 %v1091_v1  ;;  %1083 = vmatpush3.bf16.msra.mxu1 %v1091_v1  ;;  %v1107_v17 = vld [vmem:[%s1680_s0 + $0xa0] sm:$0xff]   ;;  %v1109_v19 = vld [vmem:[%s1680_s0 + $0xa8] sm:$0xff]   ;;  %v1110_v20 = vld [vmem:[%s1680_s0 + $0x30] sm:$0xff]  }
   0x8   :  { %998 = vmatprep.subr.bf16.mxu0 %v1092_v2  ;;  %1076 = vmatprep.subr.bf16.mxu1 %v1092_v2  ;;  %v1111_v21 = vld [vmem:[%s1680_s0 + $0xb0] sm:$0xff]   ;;  %v1112_v22 = vld [vmem:[%s1680_s0 + $0x38] sm:$0xff]   ;;  %v1114_v24 = vld [vmem:[%s1680_s0 + $0x40] sm:$0xff]  }
   0x9   :  { %v1113_v23 = vld [vmem:[%s1680_s0 + $0xb8] sm:$0xff]   ;;  %v1115_v25 = vld [vmem:[%s1680_s0 + $0xc0] sm:$0xff]   ;;  %v1116_v26 = vld [vmem:[%s1680_s0 + $0x48] sm:$0xff]  }
   0xa   :  { %v1117_v27 = vld [vmem:[%s1680_s0 + $0xc8] sm:$0xff]   ;;  %v1118_v28 = vld [vmem:[%s1680_s0 + $0x50] sm:$0xff]   ;;  %v1120_v30 = vld [vmem:[%s1680_s0 + $0x58] sm:$0xff]  }
   0xb   :  { %999 = vmatpush3.bf16.msra.mxu0 %v1092_v2  ;;  %1084 = vmatpush3.bf16.msra.mxu1 %v1092_v2  ;;  %v1119_v29 = vld [vmem:[%s1680_s0 + $0xd0] sm:$0xff]   ;;  %v1121_v31 = vld [vmem:[%s1680_s0 + $0xd8] sm:$0xff]   ;;  %v1122_v32 = vld [vmem:[%s1680_s0 + $0x60] sm:$0xff]  }
   0xc   :  { %1000 = vmatprep.subr.bf16.mxu0 %v1093_v3  ;;  %1077 = vmatprep.subr.bf16.mxu1 %v1093_v3  ;;  %v1123_v33 = vld [vmem:[%s1680_s0 + $0xe0] sm:$0xff]   ;;  %v1124_v34 = vld [vmem:[%s1680_s0 + $0x68] sm:$0xff]   ;;  %v1126_v36 = vld [vmem:[%s1680_s0 + $0x70] sm:$0xff]  }
   0xd   :  { %v1125_v35 = vld [vmem:[%s1680_s0 + $0xe8] sm:$0xff]   ;;  %v1127_v37 = vld [vmem:[%s1680_s0 + $0xf0] sm:$0xff]   ;;  %v1128_v38 = vld [vmem:[%s1680_s0 + $0x78] sm:$0xff]  }
   0xe   :  { %v1129_v39 = vld [vmem:[%s1680_s0 + $0xf8] sm:$0xff]   ;;  %v1283_v40 = vld [vmem:[%s1681_s2] ss:$0 sm:$0xff] }
   0xf   :  { %1001 = vmatpush3.bf16.msra.mxu0 %v1093_v3  ;;  %1085 = vmatpush3.bf16.msra.mxu1 %v1093_v3  ;;  %v1290_v47 = vld [vmem:[%s1682_s3] ss:$0 sm:$0xff] }
  0x10   :  { %1002 = vmatprep.subr.bf16.mxu0 %v1094_v6  ;;  %1078 = vmatprep.subr.bf16.mxu1 %v1094_v6  ;;  %v1299_v58 = vld [vmem:[%s1683_s4] ss:$0 sm:$0xff] }
  0x13   :  { %1003 = vmatpush3.bf16.msra.mxu0 %v1094_v6  ;;  %1086 = vmatpush3.bf16.msra.mxu1 %v1094_v6 }
  0x14   :  { %1004 = vmatprep.subr.bf16.mxu0 %v1095_v7  ;;  %1079 = vmatprep.subr.bf16.mxu1 %v1095_v7 }
  0x17   :  { %1005 = vmatpush3.bf16.msra.mxu0 %v1095_v7  ;;  %1087 = vmatpush3.bf16.msra.mxu1 %v1095_v7 }
  0x18   :  { %1006 = vmatprep.subr.bf16.mxu0 %v1096_v8  ;;  %1080 = vmatprep.subr.bf16.mxu1 %v1096_v8 }
  0x1b   :  { %1007 = vmatpush3.bf16.msra.mxu0 %v1096_v8  ;;  %1088 = vmatpush3.bf16.msra.mxu1 %v1096_v8 }
  0x1c   :  { %1008 = vmatprep.subr.bf16.mxu0 %v1097_v9  ;;  %1081 = vmatprep.subr.bf16.mxu1 %v1097_v9 }
  0x1f   :  { %1009 = vmatpush3.bf16.msra.mxu0 %v1097_v9  ;;  %1089 = vmatpush3.bf16.msra.mxu1 %v1097_v9 }
  0x22   :  { %1011 = vmatmul.mubr.bf16.vlgmr.msra.gmra.mrb[0].mxu0 %v1100_v10  ;;  %1043 = vmatmul.mubr.bf16.vlgmr.msra.gmra.mrb[0].mxu1 %v1101_v11 }
  0x23   :  { %1014 = vmatprep.mubr.bf16.mxu0 %v1102_v12  ;;  %1046 = vmatprep.mubr.bf16.mxu1 %v1103_v13 }
  0x2a   :  { %1015 = vmatmul.mubr.bf16.gmra.mrb[4].mxu0 %v1104_v14  ;;  %1047 = vmatmul.mubr.bf16.gmra.mrb[4].mxu1 %v1105_v15 }
  0x2b   :  { %1018 = vmatprep.mubr.bf16.mxu0 %v1106_v16  ;;  %1050 = vmatprep.mubr.bf16.mxu1 %v1107_v17 }
  0x32   :  { %1019 = vmatmul.mubr.bf16.gmra.mrb[8].mxu0 %v1108_v18  ;;  %1051 = vmatmul.mubr.bf16.gmra.mrb[8].mxu1 %v1109_v19 }
  0x33   :  { %1022 = vmatprep.mubr.bf16.mxu0 %v1110_v20  ;;  %1054 = vmatprep.mubr.bf16.mxu1 %v1111_v21 }
  0x3a   :  { %1023 = vmatmul.mubr.bf16.gmra.mrb[12].mxu0 %v1112_v22  ;;  %1055 = vmatmul.mubr.bf16.gmra.mrb[12].mxu1 %v1113_v23 }
  0x3b   :  { %1026 = vmatprep.mubr.bf16.mxu0 %v1114_v24  ;;  %1058 = vmatprep.mubr.bf16.mxu1 %v1115_v25 }
  0x42   :  { %1027 = vmatmul.mubr.bf16.gmra.mrb[16].mxu0 %v1116_v26  ;;  %1059 = vmatmul.mubr.bf16.gmra.mrb[16].mxu1 %v1117_v27 }
  0x43   :  { %1030 = vmatprep.mubr.bf16.mxu0 %v1118_v28  ;;  %1062 = vmatprep.mubr.bf16.mxu1 %v1119_v29 }
  0x4a   :  { %1031 = vmatmul.mubr.bf16.gmra.mrb[20].mxu0 %v1120_v30  ;;  %1063 = vmatmul.mubr.bf16.gmra.mrb[20].mxu1 %v1121_v31 }
  0x4b   :  { %1034 = vmatprep.mubr.bf16.mxu0 %v1122_v32  ;;  %1066 = vmatprep.mubr.bf16.mxu1 %v1123_v33 }
  0x52   :  { %1035 = vmatmul.mubr.bf16.gmra.mrb[24].mxu0 %v1124_v34  ;;  %1067 = vmatmul.mubr.bf16.gmra.mrb[24].mxu1 %v1125_v35 }
  0x53   :  { %1038 = vmatprep.mubr.bf16.mxu0 %v1126_v36  ;;  %1070 = vmatprep.mubr.bf16.mxu1 %v1127_v37 }
  0x5a   :  { %1039 = vmatmul.mubr.bf16.gmra.mrb[28].mxu0 %v1128_v38  ;;  %1071 = vmatmul.mubr.bf16.gmra.mrb[28].mxu1 %v1129_v39 }
  0xf5   :  { %v1012_v41 = vpop.f32.mrb[0].mxu0  ;;  %v1044_v42 = vpop.f32.mrb[0].mxu1 }
  0xf6   :  { %v391_v43 = vadd.f32 %v1012_v41, %v1283_v40  ;;  %v519_v44 = vadd.f32 %v1044_v42, %v1283_v40  ;;  %v382_v45 = vpop.f32.mrb[1].mxu0  ;;  %v510_v46 = vpop.f32.mrb[1].mxu1 }
  0xf7   :  { %v383_v48 = vadd.f32 %v1283_v40, %v382_v45  ;;  %v511_v49 = vadd.f32 %v1283_v40, %v510_v46  ;;  %v1013_v50 = vpop.f32.mrb[2].mxu0  ;;  %v1045_v51 = vpop.f32.mrb[2].mxu1 }
  0xf8   :  { %v639_v52 = vmax.f32 %v391_v43, 0.0  ;;  %v671_v53 = vmax.f32 %v519_v44, 0.0  ;;  %v394_v54 = vadd.f32 %v1013_v50, %v1283_v40  ;;  %v522_v55 = vadd.f32 %v1045_v51, %v1283_v40  ;;  %v385_v56 = vpop.f32.mrb[3].mxu0  ;;  %v513_v57 = vpop.f32.mrb[3].mxu1 }
  0xf9   :  { %v637_v59 = vmax.f32 %v383_v48, 0.0  ;;  %v669_v60 = vmax.f32 %v511_v49, 0.0  ;;  %v386_v61 = vadd.f32 %v1283_v40, %v385_v56  ;;  %v514_v62 = vadd.f32 %v1283_v40, %v513_v57 }
  0xfa   :  { %v710_v63 = vmul.f32 %v1290_v47, %v639_v52  ;;  %v742_v0 = vmul.f32 %v1290_v47, %v671_v53  ;;  %v640_v1 = vmax.f32 %v394_v54, 0.0  ;;  %v672_v2 = vmax.f32 %v522_v55, 0.0 }
  0xfb   :  { %v708_v3 = vmul.f32 %v1290_v47, %v637_v59  ;;  %v740_v4 = vmul.f32 %v1290_v47, %v669_v60  ;;  %v638_v5 = vmax.f32 %v386_v61, 0.0  ;;  %v670_v6 = vmax.f32 %v514_v62, 0.0 }
  0xfc   :  { %v781_v7 = vadd.f32 %v1299_v58, %v710_v63  ;;  %v813_v8 = vadd.f32 %v1299_v58, %v742_v0  ;;  %v711_v9 = vmul.f32 %v1290_v47, %v640_v1  ;;  %v743_v10 = vmul.f32 %v1290_v47, %v672_v2 }
  0xfd   :  { %v779_v11 = vadd.f32 %v1299_v58, %v708_v3  ;;  %v811_v12 = vadd.f32 %v1299_v58, %v740_v4  ;;  %v709_v13 = vmul.f32 %v1290_v47, %v638_v5  ;;  %v741_v14 = vmul.f32 %v1290_v47, %v670_v6  ;;  %v1016_v15 = vpop.f32.mrb[4].mxu0  ;;  %v1048_v16 = vpop.f32.mrb[4].mxu1 }
  0xfe   :  { %845 = vst [vmem:[%s1684_s5 + $0x10] sm:$0xff] %v781_v7  ;;  %877 = vst [vmem:[%s1684_s5 + $0x110] sm:$0xff] %v813_v8  ;;  %v782_v17 = vadd.f32 %v1299_v58, %v711_v9  ;;  %v814_v18 = vadd.f32 %v1299_v58, %v743_v10  ;;  %v407_v19 = vadd.f32 %v1016_v15, %v1283_v40  ;;  %v398_v21 = vpop.f32.mrb[5].mxu0  ;;  %v526_v22 = vpop.f32.mrb[5].mxu1 }
  0xff   :  { %v535_v20 = vadd.f32 %v1048_v16, %v1283_v40  ;;  %843 = vst [vmem:[%s1684_s5] sm:$0xff] %v779_v11  ;;  %875 = vst [vmem:[%s1684_s5 + $0x100] sm:$0xff] %v811_v12  ;;  %v780_v23 = vadd.f32 %v1299_v58, %v709_v13  ;;  %v812_v24 = vadd.f32 %v1299_v58, %v741_v14  ;;  %v1017_v27 = vpop.f32.mrb[6].mxu0  ;;  %v1049_v28 = vpop.f32.mrb[6].mxu1 }
 0x100   :  { %v399_v25 = vadd.f32 %v1283_v40, %v398_v21  ;;  %v527_v26 = vadd.f32 %v1283_v40, %v526_v22  ;;  %846 = vst [vmem:[%s1684_s5 + $0x18] sm:$0xff] %v782_v17  ;;  %878 = vst [vmem:[%s1684_s5 + $0x118] sm:$0xff] %v814_v18  ;;  %v643_v29 = vmax.f32 %v407_v19, 0.0  ;;  %v410_v31 = vadd.f32 %v1017_v27, %v1283_v40  ;;  %v401_v33 = vpop.f32.mrb[7].mxu0  ;;  %v529_v34 = vpop.f32.mrb[7].mxu1 }
 0x101   :  { %v675_v30 = vmax.f32 %v535_v20, 0.0  ;;  %v538_v32 = vadd.f32 %v1049_v28, %v1283_v40  ;;  %844 = vst [vmem:[%s1684_s5 + $0x8] sm:$0xff] %v780_v23  ;;  %876 = vst [vmem:[%s1684_s5 + $0x108] sm:$0xff] %v812_v24  ;;  %v402_v37 = vadd.f32 %v1283_v40, %v401_v33  ;;  %v530_v38 = vadd.f32 %v1283_v40, %v529_v34 }
 0x102   :  { %v641_v35 = vmax.f32 %v399_v25, 0.0  ;;  %v673_v36 = vmax.f32 %v527_v26, 0.0  ;;  %v714_v39 = vmul.f32 %v1290_v47, %v643_v29  ;;  %v644_v42 = vmax.f32 %v410_v31, 0.0 }
 0x103   :  { %v746_v41 = vmul.f32 %v1290_v47, %v675_v30  ;;  %v676_v43 = vmax.f32 %v538_v32, 0.0  ;;  %v642_v46 = vmax.f32 %v402_v37, 0.0  ;;  %v674_v48 = vmax.f32 %v530_v38, 0.0 }
 0x104   :  { %v712_v44 = vmul.f32 %v1290_v47, %v641_v35  ;;  %v744_v45 = vmul.f32 %v1290_v47, %v673_v36  ;;  %v785_v49 = vadd.f32 %v1299_v58, %v714_v39  ;;  %v715_v51 = vmul.f32 %v1290_v47, %v644_v42 }
 0x105   :  { %v817_v50 = vadd.f32 %v1299_v58, %v746_v41  ;;  %v747_v52 = vmul.f32 %v1290_v47, %v676_v43  ;;  %v713_v55 = vmul.f32 %v1290_v47, %v642_v46  ;;  %v745_v56 = vmul.f32 %v1290_v47, %v674_v48  ;;  %v1020_v57 = vpop.f32.mrb[8].mxu0  ;;  %v1052_v59 = vpop.f32.mrb[8].mxu1 }
 0x106   :  { %v783_v53 = vadd.f32 %v1299_v58, %v712_v44  ;;  %v815_v54 = vadd.f32 %v1299_v58, %v744_v45  ;;  %849 = vst [vmem:[%s1684_s5 + $0x30] sm:$0xff] %v785_v49  ;;  %v786_v60 = vadd.f32 %v1299_v58, %v715_v51  ;;  %v423_v62 = vadd.f32 %v1020_v57, %v1283_v40  ;;  %v414_v0 = vpop.f32.mrb[9].mxu0  ;;  %v542_v1 = vpop.f32.mrb[9].mxu1 }
 0x107   :  { %881 = vst [vmem:[%s1684_s5 + $0x130] sm:$0xff] %v817_v50  ;;  %v818_v61 = vadd.f32 %v1299_v58, %v747_v52  ;;  %v551_v63 = vadd.f32 %v1052_v59, %v1283_v40  ;;  %v784_v2 = vadd.f32 %v1299_v58, %v713_v55  ;;  %v816_v3 = vadd.f32 %v1299_v58, %v745_v56  ;;  %v1021_v6 = vpop.f32.mrb[10].mxu0  ;;  %v1053_v7 = vpop.f32.mrb[10].mxu1 }
 0x108   :  { %847 = vst [vmem:[%s1684_s5 + $0x20] sm:$0xff] %v783_v53  ;;  %879 = vst [vmem:[%s1684_s5 + $0x120] sm:$0xff] %v815_v54  ;;  %v415_v4 = vadd.f32 %v1283_v40, %v414_v0  ;;  %v543_v5 = vadd.f32 %v1283_v40, %v542_v1  ;;  %v647_v8 = vmax.f32 %v423_v62, 0.0  ;;  %v426_v10 = vadd.f32 %v1021_v6, %v1283_v40  ;;  %v417_v12 = vpop.f32.mrb[11].mxu0  ;;  %v545_v13 = vpop.f32.mrb[11].mxu1 }
 0x109   :  { %850 = vst [vmem:[%s1684_s5 + $0x38] sm:$0xff] %v786_v60  ;;  %882 = vst [vmem:[%s1684_s5 + $0x138] sm:$0xff] %v818_v61  ;;  %v679_v9 = vmax.f32 %v551_v63, 0.0  ;;  %v554_v11 = vadd.f32 %v1053_v7, %v1283_v40  ;;  %v418_v16 = vadd.f32 %v1283_v40, %v417_v12  ;;  %v546_v17 = vadd.f32 %v1283_v40, %v545_v13 }
 0x10a   :  { %848 = vst [vmem:[%s1684_s5 + $0x28] sm:$0xff] %v784_v2  ;;  %880 = vst [vmem:[%s1684_s5 + $0x128] sm:$0xff] %v816_v3  ;;  %v645_v14 = vmax.f32 %v415_v4, 0.0  ;;  %v677_v15 = vmax.f32 %v543_v5, 0.0  ;;  %v718_v18 = vmul.f32 %v1290_v47, %v647_v8  ;;  %v648_v20 = vmax.f32 %v426_v10, 0.0 }
 0x10b   :  { %v750_v19 = vmul.f32 %v1290_v47, %v679_v9  ;;  %v680_v21 = vmax.f32 %v554_v11, 0.0  ;;  %v646_v24 = vmax.f32 %v418_v16, 0.0  ;;  %v678_v25 = vmax.f32 %v546_v17, 0.0 }
 0x10c   :  { %v716_v22 = vmul.f32 %v1290_v47, %v645_v14  ;;  %v748_v23 = vmul.f32 %v1290_v47, %v677_v15  ;;  %v789_v26 = vadd.f32 %v1299_v58, %v718_v18  ;;  %v719_v28 = vmul.f32 %v1290_v47, %v648_v20 }
 0x10d   :  { %v821_v27 = vadd.f32 %v1299_v58, %v750_v19  ;;  %v751_v29 = vmul.f32 %v1290_v47, %v680_v21  ;;  %v717_v32 = vmul.f32 %v1290_v47, %v646_v24  ;;  %v749_v33 = vmul.f32 %v1290_v47, %v678_v25  ;;  %v1024_v34 = vpop.f32.mrb[12].mxu0  ;;  %v1056_v35 = vpop.f32.mrb[12].mxu1 }
 0x10e   :  { %v787_v30 = vadd.f32 %v1299_v58, %v716_v22  ;;  %v819_v31 = vadd.f32 %v1299_v58, %v748_v23  ;;  %853 = vst [vmem:[%s1684_s5 + $0x50] sm:$0xff] %v789_v26  ;;  %v790_v36 = vadd.f32 %v1299_v58, %v719_v28  ;;  %v439_v38 = vadd.f32 %v1024_v34, %v1283_v40  ;;  %v430_v41 = vpop.f32.mrb[13].mxu0  ;;  %v558_v42 = vpop.f32.mrb[13].mxu1 }
 0x10f   :  { %885 = vst [vmem:[%s1684_s5 + $0x150] sm:$0xff] %v821_v27  ;;  %v822_v37 = vadd.f32 %v1299_v58, %v751_v29  ;;  %v567_v39 = vadd.f32 %v1056_v35, %v1283_v40  ;;  %v788_v43 = vadd.f32 %v1299_v58, %v717_v32  ;;  %v820_v44 = vadd.f32 %v1299_v58, %v749_v33  ;;  %v1025_v48 = vpop.f32.mrb[14].mxu0  ;;  %v1057_v49 = vpop.f32.mrb[14].mxu1 }
 0x110   :  { %851 = vst [vmem:[%s1684_s5 + $0x40] sm:$0xff] %v787_v30  ;;  %883 = vst [vmem:[%s1684_s5 + $0x140] sm:$0xff] %v819_v31  ;;  %v431_v45 = vadd.f32 %v1283_v40, %v430_v41  ;;  %v559_v46 = vadd.f32 %v1283_v40, %v558_v42  ;;  %v651_v50 = vmax.f32 %v439_v38, 0.0  ;;  %v442_v52 = vadd.f32 %v1025_v48, %v1283_v40  ;;  %v433_v54 = vpop.f32.mrb[15].mxu0  ;;  %v561_v55 = vpop.f32.mrb[15].mxu1 }
 0x111   :  { %854 = vst [vmem:[%s1684_s5 + $0x58] sm:$0xff] %v790_v36  ;;  %886 = vst [vmem:[%s1684_s5 + $0x158] sm:$0xff] %v822_v37  ;;  %v683_v51 = vmax.f32 %v567_v39, 0.0  ;;  %v570_v53 = vadd.f32 %v1057_v49, %v1283_v40  ;;  %v434_v59 = vadd.f32 %v1283_v40, %v433_v54  ;;  %v562_v60 = vadd.f32 %v1283_v40, %v561_v55 }
 0x112   :  { %852 = vst [vmem:[%s1684_s5 + $0x48] sm:$0xff] %v788_v43  ;;  %884 = vst [vmem:[%s1684_s5 + $0x148] sm:$0xff] %v820_v44  ;;  %v649_v56 = vmax.f32 %v431_v45, 0.0  ;;  %v681_v57 = vmax.f32 %v559_v46, 0.0  ;;  %v722_v61 = vmul.f32 %v1290_v47, %v651_v50  ;;  %v652_v63 = vmax.f32 %v442_v52, 0.0 }
 0x113   :  { %v754_v62 = vmul.f32 %v1290_v47, %v683_v51  ;;  %v684_v0 = vmax.f32 %v570_v53, 0.0  ;;  %v650_v3 = vmax.f32 %v434_v59, 0.0  ;;  %v682_v4 = vmax.f32 %v562_v60, 0.0 }
 0x114   :  { %v720_v1 = vmul.f32 %v1290_v47, %v649_v56  ;;  %v752_v2 = vmul.f32 %v1290_v47, %v681_v57  ;;  %v793_v5 = vadd.f32 %v1299_v58, %v722_v61  ;;  %v723_v7 = vmul.f32 %v1290_v47, %v652_v63 }
 0x115   :  { %v825_v6 = vadd.f32 %v1299_v58, %v754_v62  ;;  %v755_v8 = vmul.f32 %v1290_v47, %v684_v0  ;;  %v721_v11 = vmul.f32 %v1290_v47, %v650_v3  ;;  %v753_v12 = vmul.f32 %v1290_v47, %v682_v4  ;;  %v1028_v13 = vpop.f32.mrb[16].mxu0  ;;  %v1060_v14 = vpop.f32.mrb[16].mxu1 }
 0x116   :  { %v791_v9 = vadd.f32 %v1299_v58, %v720_v1  ;;  %v823_v10 = vadd.f32 %v1299_v58, %v752_v2  ;;  %857 = vst [vmem:[%s1684_s5 + $0x70] sm:$0xff] %v793_v5  ;;  %v794_v15 = vadd.f32 %v1299_v58, %v723_v7  ;;  %v455_v17 = vadd.f32 %v1028_v13, %v1283_v40  ;;  %v446_v19 = vpop.f32.mrb[17].mxu0  ;;  %v574_v20 = vpop.f32.mrb[17].mxu1 }
 0x117   :  { %889 = vst [vmem:[%s1684_s5 + $0x170] sm:$0xff] %v825_v6  ;;  %v826_v16 = vadd.f32 %v1299_v58, %v755_v8  ;;  %v583_v18 = vadd.f32 %v1060_v14, %v1283_v40  ;;  %v792_v21 = vadd.f32 %v1299_v58, %v721_v11  ;;  %v824_v22 = vadd.f32 %v1299_v58, %v753_v12  ;;  %v1029_v25 = vpop.f32.mrb[18].mxu0  ;;  %v1061_v26 = vpop.f32.mrb[18].mxu1 }
 0x118   :  { %855 = vst [vmem:[%s1684_s5 + $0x60] sm:$0xff] %v791_v9  ;;  %887 = vst [vmem:[%s1684_s5 + $0x160] sm:$0xff] %v823_v10  ;;  %v447_v23 = vadd.f32 %v1283_v40, %v446_v19  ;;  %v575_v24 = vadd.f32 %v1283_v40, %v574_v20  ;;  %v655_v27 = vmax.f32 %v455_v17, 0.0  ;;  %v458_v29 = vadd.f32 %v1029_v25, %v1283_v40  ;;  %v449_v31 = vpop.f32.mrb[19].mxu0  ;;  %v577_v32 = vpop.f32.mrb[19].mxu1 }
 0x119   :  { %858 = vst [vmem:[%s1684_s5 + $0x78] sm:$0xff] %v794_v15  ;;  %890 = vst [vmem:[%s1684_s5 + $0x178] sm:$0xff] %v826_v16  ;;  %v687_v28 = vmax.f32 %v583_v18, 0.0  ;;  %v586_v30 = vadd.f32 %v1061_v26, %v1283_v40  ;;  %v450_v35 = vadd.f32 %v1283_v40, %v449_v31  ;;  %v578_v36 = vadd.f32 %v1283_v40, %v577_v32 }
 0x11a   :  { %856 = vst [vmem:[%s1684_s5 + $0x68] sm:$0xff] %v792_v21  ;;  %888 = vst [vmem:[%s1684_s5 + $0x168] sm:$0xff] %v824_v22  ;;  %v653_v33 = vmax.f32 %v447_v23, 0.0  ;;  %v685_v34 = vmax.f32 %v575_v24, 0.0  ;;  %v726_v37 = vmul.f32 %v1290_v47, %v655_v27  ;;  %v656_v39 = vmax.f32 %v458_v29, 0.0 }
 0x11b   :  { %v758_v38 = vmul.f32 %v1290_v47, %v687_v28  ;;  %v688_v41 = vmax.f32 %v586_v30, 0.0  ;;  %v654_v44 = vmax.f32 %v450_v35, 0.0  ;;  %v686_v45 = vmax.f32 %v578_v36, 0.0 }
 0x11c   :  { %v724_v42 = vmul.f32 %v1290_v47, %v653_v33  ;;  %v756_v43 = vmul.f32 %v1290_v47, %v685_v34  ;;  %v797_v46 = vadd.f32 %v1299_v58, %v726_v37  ;;  %v727_v49 = vmul.f32 %v1290_v47, %v656_v39 }
 0x11d   :  { %v829_v48 = vadd.f32 %v1299_v58, %v758_v38  ;;  %v759_v50 = vmul.f32 %v1290_v47, %v688_v41  ;;  %v725_v53 = vmul.f32 %v1290_v47, %v654_v44  ;;  %v757_v54 = vmul.f32 %v1290_v47, %v686_v45  ;;  %v1032_v55 = vpop.f32.mrb[20].mxu0  ;;  %v1064_v56 = vpop.f32.mrb[20].mxu1 }
 0x11e   :  { %v795_v51 = vadd.f32 %v1299_v58, %v724_v42  ;;  %v827_v52 = vadd.f32 %v1299_v58, %v756_v43  ;;  %861 = vst [vmem:[%s1684_s5 + $0x90] sm:$0xff] %v797_v46  ;;  %v798_v57 = vadd.f32 %v1299_v58, %v727_v49  ;;  %v471_v60 = vadd.f32 %v1032_v55, %v1283_v40  ;;  %v462_v62 = vpop.f32.mrb[21].mxu0  ;;  %v590_v63 = vpop.f32.mrb[21].mxu1 }
 0x11f   :  { %893 = vst [vmem:[%s1684_s5 + $0x190] sm:$0xff] %v829_v48  ;;  %v830_v59 = vadd.f32 %v1299_v58, %v759_v50  ;;  %v599_v61 = vadd.f32 %v1064_v56, %v1283_v40  ;;  %v796_v0 = vadd.f32 %v1299_v58, %v725_v53  ;;  %v828_v1 = vadd.f32 %v1299_v58, %v757_v54  ;;  %v1033_v4 = vpop.f32.mrb[22].mxu0  ;;  %v1065_v5 = vpop.f32.mrb[22].mxu1 }
 0x120   :  { %859 = vst [vmem:[%s1684_s5 + $0x80] sm:$0xff] %v795_v51  ;;  %891 = vst [vmem:[%s1684_s5 + $0x180] sm:$0xff] %v827_v52  ;;  %v463_v2 = vadd.f32 %v1283_v40, %v462_v62  ;;  %v591_v3 = vadd.f32 %v1283_v40, %v590_v63  ;;  %v659_v6 = vmax.f32 %v471_v60, 0.0  ;;  %v474_v8 = vadd.f32 %v1033_v4, %v1283_v40  ;;  %v465_v10 = vpop.f32.mrb[23].mxu0  ;;  %v593_v11 = vpop.f32.mrb[23].mxu1 }
 0x121   :  { %862 = vst [vmem:[%s1684_s5 + $0x98] sm:$0xff] %v798_v57  ;;  %894 = vst [vmem:[%s1684_s5 + $0x198] sm:$0xff] %v830_v59  ;;  %v691_v7 = vmax.f32 %v599_v61, 0.0  ;;  %v602_v9 = vadd.f32 %v1065_v5, %v1283_v40  ;;  %v466_v14 = vadd.f32 %v1283_v40, %v465_v10  ;;  %v594_v15 = vadd.f32 %v1283_v40, %v593_v11 }
 0x122   :  { %860 = vst [vmem:[%s1684_s5 + $0x88] sm:$0xff] %v796_v0  ;;  %892 = vst [vmem:[%s1684_s5 + $0x188] sm:$0xff] %v828_v1  ;;  %v657_v12 = vmax.f32 %v463_v2, 0.0  ;;  %v689_v13 = vmax.f32 %v591_v3, 0.0  ;;  %v730_v16 = vmul.f32 %v1290_v47, %v659_v6  ;;  %v660_v18 = vmax.f32 %v474_v8, 0.0 }
 0x123   :  { %v762_v17 = vmul.f32 %v1290_v47, %v691_v7  ;;  %v692_v19 = vmax.f32 %v602_v9, 0.0  ;;  %v658_v22 = vmax.f32 %v466_v14, 0.0  ;;  %v690_v23 = vmax.f32 %v594_v15, 0.0 }
 0x124   :  { %v728_v20 = vmul.f32 %v1290_v47, %v657_v12  ;;  %v760_v21 = vmul.f32 %v1290_v47, %v689_v13  ;;  %v801_v24 = vadd.f32 %v1299_v58, %v730_v16  ;;  %v731_v26 = vmul.f32 %v1290_v47, %v660_v18 }
 0x125   :  { %v833_v25 = vadd.f32 %v1299_v58, %v762_v17  ;;  %v763_v27 = vmul.f32 %v1290_v47, %v692_v19  ;;  %v729_v30 = vmul.f32 %v1290_v47, %v658_v22  ;;  %v761_v31 = vmul.f32 %v1290_v47, %v690_v23  ;;  %v1036_v32 = vpop.f32.mrb[24].mxu0  ;;  %v1068_v33 = vpop.f32.mrb[24].mxu1 }
 0x126   :  { %v799_v28 = vadd.f32 %v1299_v58, %v728_v20  ;;  %v831_v29 = vadd.f32 %v1299_v58, %v760_v21  ;;  %865 = vst [vmem:[%s1684_s5 + $0xb0] sm:$0xff] %v801_v24  ;;  %v802_v34 = vadd.f32 %v1299_v58, %v731_v26  ;;  %v487_v36 = vadd.f32 %v1036_v32, %v1283_v40  ;;  %v478_v38 = vpop.f32.mrb[25].mxu0  ;;  %v606_v39 = vpop.f32.mrb[25].mxu1 }
 0x127   :  { %897 = vst [vmem:[%s1684_s5 + $0x1b0] sm:$0xff] %v833_v25  ;;  %v834_v35 = vadd.f32 %v1299_v58, %v763_v27  ;;  %v615_v37 = vadd.f32 %v1068_v33, %v1283_v40  ;;  %v800_v41 = vadd.f32 %v1299_v58, %v729_v30  ;;  %v832_v42 = vadd.f32 %v1299_v58, %v761_v31  ;;  %v1037_v45 = vpop.f32.mrb[26].mxu0  ;;  %v1069_v46 = vpop.f32.mrb[26].mxu1 }
 0x128   :  { %863 = vst [vmem:[%s1684_s5 + $0xa0] sm:$0xff] %v799_v28  ;;  %895 = vst [vmem:[%s1684_s5 + $0x1a0] sm:$0xff] %v831_v29  ;;  %v479_v43 = vadd.f32 %v1283_v40, %v478_v38  ;;  %v607_v44 = vadd.f32 %v1283_v40, %v606_v39  ;;  %v663_v48 = vmax.f32 %v487_v36, 0.0  ;;  %v490_v50 = vadd.f32 %v1037_v45, %v1283_v40  ;;  %v481_v52 = vpop.f32.mrb[27].mxu0  ;;  %v609_v53 = vpop.f32.mrb[27].mxu1 }
 0x129   :  { %866 = vst [vmem:[%s1684_s5 + $0xb8] sm:$0xff] %v802_v34  ;;  %898 = vst [vmem:[%s1684_s5 + $0x1b8] sm:$0xff] %v834_v35  ;;  %v695_v49 = vmax.f32 %v615_v37, 0.0  ;;  %v618_v51 = vadd.f32 %v1069_v46, %v1283_v40  ;;  %v482_v56 = vadd.f32 %v1283_v40, %v481_v52  ;;  %v610_v57 = vadd.f32 %v1283_v40, %v609_v53 }
 0x12a   :  { %864 = vst [vmem:[%s1684_s5 + $0xa8] sm:$0xff] %v800_v41  ;;  %896 = vst [vmem:[%s1684_s5 + $0x1a8] sm:$0xff] %v832_v42  ;;  %v661_v54 = vmax.f32 %v479_v43, 0.0  ;;  %v693_v55 = vmax.f32 %v607_v44, 0.0  ;;  %v734_v59 = vmul.f32 %v1290_v47, %v663_v48  ;;  %v664_v61 = vmax.f32 %v490_v50, 0.0 }
 0x12b   :  { %v766_v60 = vmul.f32 %v1290_v47, %v695_v49  ;;  %v696_v62 = vmax.f32 %v618_v51, 0.0  ;;  %v662_v1 = vmax.f32 %v482_v56, 0.0  ;;  %v694_v2 = vmax.f32 %v610_v57, 0.0 }
 0x12c   :  { %v732_v63 = vmul.f32 %v1290_v47, %v661_v54  ;;  %v764_v0 = vmul.f32 %v1290_v47, %v693_v55  ;;  %v805_v3 = vadd.f32 %v1299_v58, %v734_v59  ;;  %v735_v5 = vmul.f32 %v1290_v47, %v664_v61 }
 0x12d   :  { %v837_v4 = vadd.f32 %v1299_v58, %v766_v60  ;;  %v767_v6 = vmul.f32 %v1290_v47, %v696_v62  ;;  %v733_v9 = vmul.f32 %v1290_v47, %v662_v1  ;;  %v765_v10 = vmul.f32 %v1290_v47, %v694_v2  ;;  %v1040_v11 = vpop.f32.mrb[28].mxu0  ;;  %v1072_v12 = vpop.f32.mrb[28].mxu1 }
 0x12e   :  { %v803_v7 = vadd.f32 %v1299_v58, %v732_v63  ;;  %v835_v8 = vadd.f32 %v1299_v58, %v764_v0  ;;  %869 = vst [vmem:[%s1684_s5 + $0xd0] sm:$0xff] %v805_v3  ;;  %v806_v13 = vadd.f32 %v1299_v58, %v735_v5  ;;  %v503_v15 = vadd.f32 %v1040_v11, %v1283_v40  ;;  %v494_v17 = vpop.f32.mrb[29].mxu0  ;;  %v622_v18 = vpop.f32.mrb[29].mxu1 }
 0x12f   :  { %901 = vst [vmem:[%s1684_s5 + $0x1d0] sm:$0xff] %v837_v4  ;;  %v838_v14 = vadd.f32 %v1299_v58, %v767_v6  ;;  %v631_v16 = vadd.f32 %v1072_v12, %v1283_v40  ;;  %v804_v19 = vadd.f32 %v1299_v58, %v733_v9  ;;  %v836_v20 = vadd.f32 %v1299_v58, %v765_v10  ;;  %v1041_v23 = vpop.f32.mrb[30].mxu0  ;;  %v1073_v24 = vpop.f32.mrb[30].mxu1 }
 0x130   :  { %867 = vst [vmem:[%s1684_s5 + $0xc0] sm:$0xff] %v803_v7  ;;  %899 = vst [vmem:[%s1684_s5 + $0x1c0] sm:$0xff] %v835_v8  ;;  %v495_v21 = vadd.f32 %v1283_v40, %v494_v17  ;;  %v623_v22 = vadd.f32 %v1283_v40, %v622_v18  ;;  %v667_v25 = vmax.f32 %v503_v15, 0.0  ;;  %v506_v27 = vadd.f32 %v1041_v23, %v1283_v40  ;;  %v497_v29 = vpop.f32.mrb[31].mxu0  ;;  %v625_v30 = vpop.f32.mrb[31].mxu1 }
 0x131   :  { %870 = vst [vmem:[%s1684_s5 + $0xd8] sm:$0xff] %v806_v13  ;;  %902 = vst [vmem:[%s1684_s5 + $0x1d8] sm:$0xff] %v838_v14  ;;  %v699_v26 = vmax.f32 %v631_v16, 0.0  ;;  %v634_v28 = vadd.f32 %v1073_v24, %v1283_v40  ;;  %v498_v33 = vadd.f32 %v1283_v40, %v497_v29  ;;  %v626_v34 = vadd.f32 %v1283_v40, %v625_v30 }
 0x132   :  { %868 = vst [vmem:[%s1684_s5 + $0xc8] sm:$0xff] %v804_v19  ;;  %900 = vst [vmem:[%s1684_s5 + $0x1c8] sm:$0xff] %v836_v20  ;;  %v665_v31 = vmax.f32 %v495_v21, 0.0  ;;  %v697_v32 = vmax.f32 %v623_v22, 0.0  ;;  %v738_v35 = vmul.f32 %v1290_v47, %v667_v25  ;;  %v668_v37 = vmax.f32 %v506_v27, 0.0 }
 0x133   :  { %v770_v36 = vmul.f32 %v1290_v47, %v699_v26  ;;  %v700_v38 = vmax.f32 %v634_v28, 0.0  ;;  %v666_v42 = vmax.f32 %v498_v33, 0.0  ;;  %v698_v43 = vmax.f32 %v626_v34, 0.0 }
 0x134   :  { %v736_v39 = vmul.f32 %v1290_v47, %v665_v31  ;;  %v768_v41 = vmul.f32 %v1290_v47, %v697_v32  ;;  %v809_v44 = vadd.f32 %v1299_v58, %v738_v35  ;;  %v739_v46 = vmul.f32 %v1290_v47, %v668_v37 }
 0x135   :  { %v841_v45 = vadd.f32 %v1299_v58, %v770_v36  ;;  %v771_v40 = vmul.f32 %v1290_v47, %v700_v38  ;;  %v737_v50 = vmul.f32 %v1290_v47, %v666_v42  ;;  %v769_v51 = vmul.f32 %v1290_v47, %v698_v43 }
 0x136   :  { %v807_v48 = vadd.f32 %v1299_v58, %v736_v39  ;;  %v839_v49 = vadd.f32 %v1299_v58, %v768_v41  ;;  %873 = vst [vmem:[%s1684_s5 + $0xf0] sm:$0xff] %v809_v44  ;;  %v810_v52 = vadd.f32 %v1299_v58, %v739_v46 }
 0x137   :  { %905 = vst [vmem:[%s1684_s5 + $0x1f0] sm:$0xff] %v841_v45  ;;  %v842_v53 = vadd.f32 %v1299_v58, %v771_v40  ;;  %v808_v47 = vadd.f32 %v1299_v58, %v737_v50  ;;  %v840_v54 = vadd.f32 %v1299_v58, %v769_v51 }
 0x138   :  { %871 = vst [vmem:[%s1684_s5 + $0xe0] sm:$0xff] %v807_v48  ;;  %903 = vst [vmem:[%s1684_s5 + $0x1e0] sm:$0xff] %v839_v49 }
 0x139   :  { %874 = vst [vmem:[%s1684_s5 + $0xf8] sm:$0xff] %v810_v52  ;;  %906 = vst [vmem:[%s1684_s5 + $0x1f8] sm:$0xff] %v842_v53 }
 0x13a   :  { %872 = vst [vmem:[%s1684_s5 + $0xe8] sm:$0xff] %v808_v47  ;;  %904 = vst [vmem:[%s1684_s5 + $0x1e8] sm:$0xff] %v840_v54 }

// kernel: relation_feature_extractor_forward.7
= control target key start
LH: loop header
LB: loop body
LE: loop exit
PB: predicated region body
PF: predicated region fallthrough
CT: control target
= control target key end

     0   :  { %s623_s1 = inlined_call_operand.vmem [shape: bf16[128,128], index: 1, kind: input, shape index: {}]   ;;  %s624_s0 = inlined_call_operand.vmem [shape: bf16[128,128], index: 0, kind: input, shape index: {}]   ;;  %s625_s2 = inlined_call_operand.vmem [shape: f32[1,128], index: 2, kind: input, shape index: {}]   ;;  %s626_s3 = inlined_call_operand.vmem [shape: f32[1,128], index: 3, kind: input, shape index: {}]   ;;  %s627_s4 = inlined_call_operand.vmem [shape: f32[1,128], index: 4, kind: input, shape index: {}]   ;;  %s628_s5 = inlined_call_operand.vmem [shape: f32[128,128], index: 5, kind: output, shape index: {}]  }
   0x1   :  { %v418_v0 = vld [vmem:[%s623_s1] sm:$0xff]   ;;  %v419_v1 = vld [vmem:[%s623_s1 + $0x8] sm:$0xff]   ;;  %v420_v2 = vld [vmem:[%s623_s1 + $0x10] sm:$0xff]  }
   0x2   :  { %370 = vmatprep.subr.bf16.mxu0 %v418_v0  ;;  %402 = vmatprep.subr.bf16.mxu1 %v418_v0  ;;  %v421_v3 = vld [vmem:[%s623_s1 + $0x18] sm:$0xff]   ;;  %v426_v4 = vld [vmem:[%s624_s0] sm:$0xff]   ;;  %v423_v7 = vld [vmem:[%s623_s1 + $0x28] sm:$0xff]  }
   0x3   :  { %371 = vmatpush3.bf16.msra.mxu0 %v418_v0  ;;  %410 = vmatpush3.bf16.msra.mxu1 %v418_v0  ;;  %v427_v5 = vld [vmem:[%s624_s0 + $0x20] sm:$0xff]   ;;  %v424_v8 = vld [vmem:[%s623_s1 + $0x30] sm:$0xff]   ;;  %v425_v9 = vld [vmem:[%s623_s1 + $0x38] sm:$0xff]  }
   0x4   :  { %372 = vmatprep.subr.bf16.mxu0 %v419_v1  ;;  %403 = vmatprep.subr.bf16.mxu1 %v419_v1  ;;  %v422_v6 = vld [vmem:[%s623_s1 + $0x20] sm:$0xff]   ;;  %v428_v10 = vld [vmem:[%s624_s0 + $0x8] sm:$0xff]   ;;  %v430_v12 = vld [vmem:[%s624_s0 + $0x10] sm:$0xff]  }
   0x5   :  { %386 = vmatprep.mubr.bf16.mxu0 %v426_v4  ;;  %394 = vmatprep.mubr.bf16.mxu1 %v427_v5  ;;  %v429_v11 = vld [vmem:[%s624_s0 + $0x28] sm:$0xff]   ;;  %v431_v13 = vld [vmem:[%s624_s0 + $0x30] sm:$0xff]   ;;  %v432_v14 = vld [vmem:[%s624_s0 + $0x18] sm:$0xff]  }
   0x6   :  { %v433_v15 = vld [vmem:[%s624_s0 + $0x38] sm:$0xff]   ;;  %v515_v16 = vld [vmem:[%s625_s2] ss:$0 sm:$0xff] }
   0x7   :  { %373 = vmatpush3.bf16.msra.mxu0 %v419_v1  ;;  %411 = vmatpush3.bf16.msra.mxu1 %v419_v1  ;;  %v522_v23 = vld [vmem:[%s626_s3] ss:$0 sm:$0xff] }
   0x8   :  { %374 = vmatprep.subr.bf16.mxu0 %v420_v2  ;;  %404 = vmatprep.subr.bf16.mxu1 %v420_v2  ;;  %v531_v34 = vld [vmem:[%s627_s4] ss:$0 sm:$0xff] }
   0xb   :  { %375 = vmatpush3.bf16.msra.mxu0 %v420_v2  ;;  %412 = vmatpush3.bf16.msra.mxu1 %v420_v2 }
   0xc   :  { %376 = vmatprep.subr.bf16.mxu0 %v421_v3  ;;  %405 = vmatprep.subr.bf16.mxu1 %v421_v3 }
   0xf   :  { %377 = vmatpush3.bf16.msra.mxu0 %v421_v3  ;;  %413 = vmatpush3.bf16.msra.mxu1 %v421_v3 }
  0x10   :  { %378 = vmatprep.subr.bf16.mxu0 %v422_v6  ;;  %406 = vmatprep.subr.bf16.mxu1 %v422_v6 }
  0x13   :  { %379 = vmatpush3.bf16.msra.mxu0 %v422_v6  ;;  %414 = vmatpush3.bf16.msra.mxu1 %v422_v6 }
  0x14   :  { %380 = vmatprep.subr.bf16.mxu0 %v423_v7  ;;  %407 = vmatprep.subr.bf16.mxu1 %v423_v7 }
  0x17   :  { %381 = vmatpush3.bf16.msra.mxu0 %v423_v7  ;;  %415 = vmatpush3.bf16.msra.mxu1 %v423_v7 }
  0x18   :  { %382 = vmatprep.subr.bf16.mxu0 %v424_v8  ;;  %408 = vmatprep.subr.bf16.mxu1 %v424_v8 }
  0x1b   :  { %383 = vmatpush3.bf16.msra.mxu0 %v424_v8  ;;  %416 = vmatpush3.bf16.msra.mxu1 %v424_v8 }
  0x1c   :  { %384 = vmatprep.subr.bf16.mxu0 %v425_v9  ;;  %409 = vmatprep.subr.bf16.mxu1 %v425_v9 }
  0x1f   :  { %385 = vmatpush3.bf16.msra.mxu0 %v425_v9  ;;  %417 = vmatpush3.bf16.msra.mxu1 %v425_v9 }
  0x22   :  { %387 = vmatmul.mubr.bf16.vlgmr.msra.gmra.mrb[0].mxu0 %v428_v10  ;;  %395 = vmatmul.mubr.bf16.vlgmr.msra.gmra.mrb[0].mxu1 %v429_v11 }
  0x23   :  { %390 = vmatprep.mubr.bf16.mxu0 %v430_v12  ;;  %398 = vmatprep.mubr.bf16.mxu1 %v431_v13 }
  0x2a   :  { %391 = vmatmul.mubr.bf16.gmra.mrb[4].mxu0 %v432_v14  ;;  %399 = vmatmul.mubr.bf16.gmra.mrb[4].mxu1 %v433_v15 }
  0xf5   :  { %v388_v17 = vpop.f32.mrb[0].mxu0  ;;  %v396_v18 = vpop.f32.mrb[0].mxu1 }
  0xf6   :  { %v199_v19 = vadd.f32 %v388_v17, %v515_v16  ;;  %v231_v20 = vadd.f32 %v396_v18, %v515_v16  ;;  %v190_v21 = vpop.f32.mrb[1].mxu0  ;;  %v222_v22 = vpop.f32.mrb[1].mxu1 }
  0xf7   :  { %v191_v24 = vadd.f32 %v515_v16, %v190_v21  ;;  %v223_v25 = vadd.f32 %v515_v16, %v222_v22  ;;  %v389_v26 = vpop.f32.mrb[2].mxu0  ;;  %v397_v27 = vpop.f32.mrb[2].mxu1 }
  0xf8   :  { %v255_v28 = vmax.f32 %v199_v19, 0.0  ;;  %v263_v29 = vmax.f32 %v231_v20, 0.0  ;;  %v202_v30 = vadd.f32 %v389_v26, %v515_v16  ;;  %v234_v31 = vadd.f32 %v397_v27, %v515_v16  ;;  %v193_v32 = vpop.f32.mrb[3].mxu0  ;;  %v225_v33 = vpop.f32.mrb[3].mxu1 }
  0xf9   :  { %v253_v35 = vmax.f32 %v191_v24, 0.0  ;;  %v261_v36 = vmax.f32 %v223_v25, 0.0  ;;  %v194_v37 = vadd.f32 %v515_v16, %v193_v32  ;;  %v226_v38 = vadd.f32 %v515_v16, %v225_v33 }
  0xfa   :  { %v278_v39 = vmul.f32 %v522_v23, %v255_v28  ;;  %v286_v40 = vmul.f32 %v522_v23, %v263_v29  ;;  %v256_v41 = vmax.f32 %v202_v30, 0.0  ;;  %v264_v42 = vmax.f32 %v234_v31, 0.0 }
  0xfb   :  { %v276_v43 = vmul.f32 %v522_v23, %v253_v35  ;;  %v284_v44 = vmul.f32 %v522_v23, %v261_v36  ;;  %v254_v45 = vmax.f32 %v194_v37, 0.0  ;;  %v262_v46 = vmax.f32 %v226_v38, 0.0 }
  0xfc   :  { %v301_v47 = vadd.f32 %v531_v34, %v278_v39  ;;  %v309_v48 = vadd.f32 %v531_v34, %v286_v40  ;;  %v279_v49 = vmul.f32 %v522_v23, %v256_v41  ;;  %v287_v50 = vmul.f32 %v522_v23, %v264_v42 }
  0xfd   :  { %v299_v51 = vadd.f32 %v531_v34, %v276_v43  ;;  %v307_v52 = vadd.f32 %v531_v34, %v284_v44  ;;  %v277_v53 = vmul.f32 %v522_v23, %v254_v45  ;;  %v285_v54 = vmul.f32 %v522_v23, %v262_v46  ;;  %v392_v55 = vpop.f32.mrb[4].mxu0  ;;  %v400_v56 = vpop.f32.mrb[4].mxu1 }
  0xfe   :  { %317 = vst [vmem:[%s628_s5 + $0x10] sm:$0xff] %v301_v47  ;;  %325 = vst [vmem:[%s628_s5 + $0x50] sm:$0xff] %v309_v48  ;;  %v302_v57 = vadd.f32 %v531_v34, %v279_v49  ;;  %v310_v58 = vadd.f32 %v531_v34, %v287_v50  ;;  %v215_v59 = vadd.f32 %v392_v55, %v515_v16  ;;  %v206_v61 = vpop.f32.mrb[5].mxu0  ;;  %v238_v62 = vpop.f32.mrb[5].mxu1 }
  0xff   :  { %v247_v60 = vadd.f32 %v400_v56, %v515_v16  ;;  %315 = vst [vmem:[%s628_s5] sm:$0xff] %v299_v51  ;;  %323 = vst [vmem:[%s628_s5 + $0x40] sm:$0xff] %v307_v52  ;;  %v300_v63 = vadd.f32 %v531_v34, %v277_v53  ;;  %v308_v0 = vadd.f32 %v531_v34, %v285_v54  ;;  %v393_v3 = vpop.f32.mrb[6].mxu0  ;;  %v401_v4 = vpop.f32.mrb[6].mxu1 }
 0x100   :  { %v207_v1 = vadd.f32 %v515_v16, %v206_v61  ;;  %v239_v2 = vadd.f32 %v515_v16, %v238_v62  ;;  %318 = vst [vmem:[%s628_s5 + $0x18] sm:$0xff] %v302_v57  ;;  %326 = vst [vmem:[%s628_s5 + $0x58] sm:$0xff] %v310_v58  ;;  %v259_v5 = vmax.f32 %v215_v59, 0.0  ;;  %v218_v7 = vadd.f32 %v393_v3, %v515_v16  ;;  %v209_v9 = vpop.f32.mrb[7].mxu0  ;;  %v241_v10 = vpop.f32.mrb[7].mxu1 }
 0x101   :  { %v267_v6 = vmax.f32 %v247_v60, 0.0  ;;  %v250_v8 = vadd.f32 %v401_v4, %v515_v16  ;;  %316 = vst [vmem:[%s628_s5 + $0x8] sm:$0xff] %v300_v63  ;;  %324 = vst [vmem:[%s628_s5 + $0x48] sm:$0xff] %v308_v0  ;;  %v210_v13 = vadd.f32 %v515_v16, %v209_v9  ;;  %v242_v14 = vadd.f32 %v515_v16, %v241_v10 }
 0x102   :  { %v257_v11 = vmax.f32 %v207_v1, 0.0  ;;  %v265_v12 = vmax.f32 %v239_v2, 0.0  ;;  %v282_v15 = vmul.f32 %v522_v23, %v259_v5  ;;  %v260_v18 = vmax.f32 %v218_v7, 0.0 }
 0x103   :  { %v290_v17 = vmul.f32 %v522_v23, %v267_v6  ;;  %v268_v19 = vmax.f32 %v250_v8, 0.0  ;;  %v258_v22 = vmax.f32 %v210_v13, 0.0  ;;  %v266_v24 = vmax.f32 %v242_v14, 0.0 }
 0x104   :  { %v280_v20 = vmul.f32 %v522_v23, %v257_v11  ;;  %v288_v21 = vmul.f32 %v522_v23, %v265_v12  ;;  %v305_v25 = vadd.f32 %v531_v34, %v282_v15  ;;  %v283_v27 = vmul.f32 %v522_v23, %v260_v18 }
 0x105   :  { %v313_v26 = vadd.f32 %v531_v34, %v290_v17  ;;  %v291_v16 = vmul.f32 %v522_v23, %v268_v19  ;;  %v281_v30 = vmul.f32 %v522_v23, %v258_v22  ;;  %v289_v31 = vmul.f32 %v522_v23, %v266_v24 }
 0x106   :  { %v303_v28 = vadd.f32 %v531_v34, %v280_v20  ;;  %v311_v29 = vadd.f32 %v531_v34, %v288_v21  ;;  %321 = vst [vmem:[%s628_s5 + $0x30] sm:$0xff] %v305_v25  ;;  %v306_v32 = vadd.f32 %v531_v34, %v283_v27 }
 0x107   :  { %329 = vst [vmem:[%s628_s5 + $0x70] sm:$0xff] %v313_v26  ;;  %v314_v33 = vadd.f32 %v531_v34, %v291_v16  ;;  %v304_v23 = vadd.f32 %v531_v34, %v281_v30  ;;  %v312_v35 = vadd.f32 %v531_v34, %v289_v31 }
 0x108   :  { %319 = vst [vmem:[%s628_s5 + $0x20] sm:$0xff] %v303_v28  ;;  %327 = vst [vmem:[%s628_s5 + $0x60] sm:$0xff] %v311_v29 }
 0x109   :  { %322 = vst [vmem:[%s628_s5 + $0x38] sm:$0xff] %v306_v32  ;;  %330 = vst [vmem:[%s628_s5 + $0x78] sm:$0xff] %v314_v33 }
 0x10a   :  { %320 = vst [vmem:[%s628_s5 + $0x28] sm:$0xff] %v304_v23  ;;  %328 = vst [vmem:[%s628_s5 + $0x68] sm:$0xff] %v312_v35 }

// kernel: relation_feature_extractor_forward.8
= control target key start
LH: loop header
LB: loop body
LE: loop exit
PB: predicated region body
PF: predicated region fallthrough
CT: control target
= control target key end

     0   :  { %s2402_s1 = inlined_call_operand.vmem [shape: bf16[1024,128], index: 1, kind: input, shape index: {}]   ;;  %s2403_s0 = inlined_call_operand.vmem [shape: bf16[128,1024], index: 0, kind: input, shape index: {}]   ;;  %s2404_s2 = inlined_call_operand.vmem [shape: f32[1,128], index: 2, kind: input, shape index: {}, may-alias: {2,4}]   ;;  %s2405_s3 = inlined_call_operand.vmem [shape: f32[1,128], index: 3, kind: input, shape index: {}]   ;;  %s2406_s4 = inlined_call_operand.vmem [shape: f32[1,128], index: 4, kind: input, shape index: {}, may-alias: {2,4}]   ;;  %s2407_s5 = inlined_call_operand.vmem [shape: f32[128,128], index: 5, kind: output, shape index: {}]  }
   0x1   :  { %v1765_v0 = vld [vmem:[%s2402_s1 + $0x40] sm:$0xff]   ;;  %v1769_v4 = vld [vmem:[%s2402_s1 + $0x48] sm:$0xff]   ;;  %v1773_v8 = vld [vmem:[%s2402_s1 + $0x50] sm:$0xff]  }
   0x2   :  { %v1766_v1 = vld [vmem:[%s2402_s1 + $0xc0] sm:$0xff]   ;;  %1509 = vmatprep.subr.bf16.mxu0 %v1765_v0  ;;  %v1770_v5 = vld [vmem:[%s2402_s1 + $0xc8] sm:$0xff]   ;;  %v1774_v9 = vld [vmem:[%s2402_s1 + $0xd0] sm:$0xff]  }
   0x3   :  { %v1767_v2 = vld [vmem:[%s2402_s1] sm:$0xff]   ;;  %1573 = vmatprep.subr.bf16.mxu1 %v1766_v1  ;;  %v1771_v6 = vld [vmem:[%s2402_s1 + $0x8] sm:$0xff]   ;;  %v1775_v10 = vld [vmem:[%s2402_s1 + $0x10] sm:$0xff]  }
   0x4   :  { %v1768_v3 = vld [vmem:[%s2402_s1 + $0x80] sm:$0xff]   ;;  %1510 = vmatpush3.bf16.msra.mxu0 %v1767_v2  ;;  %v1772_v7 = vld [vmem:[%s2402_s1 + $0x88] sm:$0xff]   ;;  %v1776_v11 = vld [vmem:[%s2402_s1 + $0x90] sm:$0xff]  }
   0x5   :  { %1574 = vmatpush3.bf16.msra.mxu1 %v1768_v3  ;;  %1511 = vmatprep.subr.bf16.mxu0 %v1769_v4  ;;  %v1777_v12 = vld [vmem:[%s2402_s1 + $0x58] sm:$0xff]   ;;  %v1781_v16 = vld [vmem:[%s2402_s1 + $0x60] sm:$0xff]   ;;  %v1785_v20 = vld [vmem:[%s2402_s1 + $0x68] sm:$0xff]  }
   0x6   :  { %1575 = vmatprep.subr.bf16.mxu1 %v1770_v5  ;;  %v1778_v13 = vld [vmem:[%s2402_s1 + $0xd8] sm:$0xff]   ;;  %v1782_v17 = vld [vmem:[%s2402_s1 + $0xe0] sm:$0xff]   ;;  %v1786_v21 = vld [vmem:[%s2402_s1 + $0xe8] sm:$0xff]  }
   0x7   :  { %v1779_v14 = vld [vmem:[%s2402_s1 + $0x18] sm:$0xff]   ;;  %v1783_v18 = vld [vmem:[%s2402_s1 + $0x20] sm:$0xff]   ;;  %v1787_v22 = vld [vmem:[%s2402_s1 + $0x28] sm:$0xff]  }
   0x8   :  { %1512 = vmatpush3.bf16.msra.mxu0 %v1771_v6  ;;  %v1780_v15 = vld [vmem:[%s2402_s1 + $0x98] sm:$0xff]   ;;  %v1784_v19 = vld [vmem:[%s2402_s1 + $0xa0] sm:$0xff]   ;;  %v1788_v23 = vld [vmem:[%s2402_s1 + $0xa8] sm:$0xff]  }
   0x9   :  { %1576 = vmatpush3.bf16.msra.mxu1 %v1772_v7  ;;  %1513 = vmatprep.subr.bf16.mxu0 %v1773_v8  ;;  %v1789_v24 = vld [vmem:[%s2402_s1 + $0x70] sm:$0xff]   ;;  %v1793_v28 = vld [vmem:[%s2402_s1 + $0x78] sm:$0xff]   ;;  %v21_v32 = vld [vmem:[%s2403_s0] sm:$0xff] }
   0xa   :  { %1577 = vmatprep.subr.bf16.mxu1 %v1774_v9  ;;  %v1790_v25 = vld [vmem:[%s2402_s1 + $0xf0] sm:$0xff]   ;;  %v1794_v29 = vld [vmem:[%s2402_s1 + $0xf8] sm:$0xff]   ;;  %v25_v33 = vld [vmem:[%s2403_s0 + $0x20] sm:$0xff] }
   0xb   :  { %v1791_v26 = vld [vmem:[%s2402_s1 + $0x30] sm:$0xff]   ;;  %v1795_v30 = vld [vmem:[%s2402_s1 + $0x38] sm:$0xff]   ;;  %v22_v34 = vld [vmem:[%s2403_s0 + $0x8] sm:$0xff]  ;;  %v1379_v35 = vcombine.low %v21_v32, %v25_v33  ;;  %v1380_v36 = vcombine.high %v21_v32, %v25_v33 }
   0xc   :  { %1514 = vmatpush3.bf16.msra.mxu0 %v1775_v10  ;;  %v1792_v27 = vld [vmem:[%s2402_s1 + $0xb0] sm:$0xff]   ;;  %v1796_v31 = vld [vmem:[%s2402_s1 + $0xb8] sm:$0xff]   ;;  %v26_v37 = vld [vmem:[%s2403_s0 + $0x28] sm:$0xff] }
   0xd   :  { %1578 = vmatpush3.bf16.msra.mxu1 %v1776_v11  ;;  %1515 = vmatprep.subr.bf16.mxu0 %v1777_v12  ;;  %v1381_v38 = vcombine.low %v22_v34, %v26_v37  ;;  %v1382_v39 = vcombine.high %v22_v34, %v26_v37  ;;  %v1797_v40 = vld [vmem:[%s2402_s1 + $0x140] sm:$0xff]   ;;  %v30_v47 = vld [vmem:[%s2403_s0 + $0x48] sm:$0xff]  ;;  %v1805_v62 = vld [vmem:[%s2402_s1 + $0x150] sm:$0xff]  }
   0xe   :  { %1579 = vmatprep.subr.bf16.mxu1 %v1778_v13  ;;  %956 = vmatprep.mubr.bf16.mxu0 %v1380_v36  ;;  %v1798_v41 = vld [vmem:[%s2402_s1 + $0x100] sm:$0xff]   ;;  %v34_v48 = vld [vmem:[%s2403_s0 + $0x68] sm:$0xff]  ;;  %v1806_v63 = vld [vmem:[%s2402_s1 + $0x110] sm:$0xff]  }
   0xf   :  { %1053 = vmatprep.mubr.bf16.mxu1 %v1382_v39  ;;  %v1799_v42 = vld [vmem:[%s2402_s1 + $0x1c0] sm:$0xff]   ;;  %v1390_v49 = vcombine.high %v30_v47, %v34_v48  ;;  %v1801_v50 = vld [vmem:[%s2402_s1 + $0x148] sm:$0xff]   ;;  %v1389_v53 = vcombine.low %v30_v47, %v34_v48  ;;  %v1807_v0 = vld [vmem:[%s2402_s1 + $0x1d0] sm:$0xff]  }
  0x10   :  { %1516 = vmatpush3.bf16.msra.mxu0 %v1779_v14  ;;  %v1800_v43 = vld [vmem:[%s2402_s1 + $0x180] sm:$0xff]   ;;  %v1802_v52 = vld [vmem:[%s2402_s1 + $0x108] sm:$0xff]   ;;  %v1808_v1 = vld [vmem:[%s2402_s1 + $0x190] sm:$0xff]  }
  0x11   :  { %1580 = vmatpush3.bf16.msra.mxu1 %v1780_v15  ;;  %1517 = vmatprep.subr.bf16.mxu0 %v1781_v16  ;;  %v29_v44 = vld [vmem:[%s2403_s0 + $0x40] sm:$0xff]  ;;  %v1803_v54 = vld [vmem:[%s2402_s1 + $0x1c8] sm:$0xff]   ;;  %v1809_v10 = vld [vmem:[%s2402_s1 + $0x158] sm:$0xff]  }
  0x12   :  { %1581 = vmatprep.subr.bf16.mxu1 %v1782_v17  ;;  %v33_v45 = vld [vmem:[%s2403_s0 + $0x60] sm:$0xff]  ;;  %v1804_v55 = vld [vmem:[%s2402_s1 + $0x188] sm:$0xff]   ;;  %v1810_v11 = vld [vmem:[%s2402_s1 + $0x118] sm:$0xff]  }
  0x13   :  { %v1388_v46 = vcombine.high %v29_v44, %v33_v45  ;;  %v1387_v51 = vcombine.low %v29_v44, %v33_v45  ;;  %v37_v56 = vld [vmem:[%s2403_s0 + $0x80] sm:$0xff]  ;;  %v38_v58 = vld [vmem:[%s2403_s0 + $0x88] sm:$0xff]  ;;  %v1811_v12 = vld [vmem:[%s2402_s1 + $0x1d8] sm:$0xff]  }
  0x14   :  { %1518 = vmatpush3.bf16.msra.mxu0 %v1783_v18  ;;  %v41_v57 = vld [vmem:[%s2403_s0 + $0xa0] sm:$0xff]  ;;  %v42_v59 = vld [vmem:[%s2403_s0 + $0xa8] sm:$0xff]  ;;  %v1812_v13 = vld [vmem:[%s2402_s1 + $0x198] sm:$0xff]  }
  0x15   :  { %1582 = vmatpush3.bf16.msra.mxu1 %v1784_v19  ;;  %1519 = vmatprep.subr.bf16.mxu0 %v1785_v20  ;;  %v1396_v60 = vcombine.high %v37_v56, %v41_v57  ;;  %v1398_v61 = vcombine.high %v38_v58, %v42_v59  ;;  %v1395_v2 = vcombine.low %v37_v56, %v41_v57  ;;  %v45_v3 = vld [vmem:[%s2403_s0 + $0xc0] sm:$0xff]  ;;  %v46_v5 = vld [vmem:[%s2403_s0 + $0xc8] sm:$0xff]  ;;  %v1822_v39 = vld [vmem:[%s2402_s1 + $0x130] sm:$0xff]  }
  0x16   :  { %1583 = vmatprep.subr.bf16.mxu1 %v1786_v21  ;;  %v49_v4 = vld [vmem:[%s2403_s0 + $0xe0] sm:$0xff]  ;;  %v1397_v6 = vcombine.low %v38_v58, %v42_v59  ;;  %v50_v8 = vld [vmem:[%s2403_s0 + $0xe8] sm:$0xff]  ;;  %v1826_v48 = vld [vmem:[%s2402_s1 + $0x138] sm:$0xff]  }
  0x17   :  { %v1404_v7 = vcombine.high %v45_v3, %v49_v4  ;;  %v1406_v9 = vcombine.high %v46_v5, %v50_v8  ;;  %v53_v14 = vld [vmem:[%s2403_s0 + $0x100] sm:$0xff]  ;;  %v54_v16 = vld [vmem:[%s2403_s0 + $0x108] sm:$0xff]  ;;  %v1403_v19 = vcombine.low %v45_v3, %v49_v4  ;;  %v1405_v21 = vcombine.low %v46_v5, %v50_v8  ;;  %v32_v8 = vld [vmem:[%s2403_s0 + $0x58] sm:$0xff] }
  0x18   :  { %1520 = vmatpush3.bf16.msra.mxu0 %v1787_v22  ;;  %v57_v15 = vld [vmem:[%s2403_s0 + $0x120] sm:$0xff]  ;;  %v58_v17 = vld [vmem:[%s2403_s0 + $0x128] sm:$0xff] }
  0x19   :  { %1584 = vmatpush3.bf16.msra.mxu1 %v1788_v23  ;;  %1521 = vmatprep.subr.bf16.mxu0 %v1789_v24  ;;  %v1813_v18 = vld [vmem:[%s2402_s1 + $0x160] sm:$0xff]   ;;  %v1412_v22 = vcombine.high %v53_v14, %v57_v15  ;;  %v1414_v24 = vcombine.high %v54_v16, %v58_v17  ;;  %v1819_v32 = vld [vmem:[%s2402_s1 + $0x1e8] sm:$0xff]   ;;  %v1411_v34 = vcombine.low %v53_v14, %v57_v15  ;;  %v39_v14 = vld [vmem:[%s2403_s0 + $0x90] sm:$0xff] }
  0x1a   :  { %1585 = vmatprep.subr.bf16.mxu1 %v1790_v25  ;;  %v1814_v20 = vld [vmem:[%s2402_s1 + $0x120] sm:$0xff]   ;;  %v1820_v33 = vld [vmem:[%s2402_s1 + $0x1a8] sm:$0xff]   ;;  %v43_v15 = vld [vmem:[%s2403_s0 + $0xb0] sm:$0xff] }
  0x1b   :  { %v1815_v23 = vld [vmem:[%s2402_s1 + $0x1e0] sm:$0xff]   ;;  %v70_v44 = vld [vmem:[%s2403_s0 + $0x188] sm:$0xff] }
  0x1c   :  { %1522 = vmatpush3.bf16.msra.mxu0 %v1791_v26  ;;  %v1816_v25 = vld [vmem:[%s2402_s1 + $0x1a0] sm:$0xff]   ;;  %v74_v45 = vld [vmem:[%s2403_s0 + $0x1a8] sm:$0xff] }
  0x1d   :  { %1586 = vmatpush3.bf16.msra.mxu1 %v1792_v27  ;;  %1523 = vmatprep.subr.bf16.mxu0 %v1793_v28  ;;  %v61_v26 = vld [vmem:[%s2403_s0 + $0x140] sm:$0xff]  ;;  %v1817_v28 = vld [vmem:[%s2402_s1 + $0x168] sm:$0xff]   ;;  %v1429_v59 = vcombine.low %v70_v44, %v74_v45 }
  0x1e   :  { %1587 = vmatprep.subr.bf16.mxu1 %v1794_v29  ;;  %v65_v27 = vld [vmem:[%s2403_s0 + $0x160] sm:$0xff]  ;;  %v62_v29 = vld [vmem:[%s2403_s0 + $0x148] sm:$0xff] }
  0x1f   :  { %v1420_v36 = vcombine.high %v61_v26, %v65_v27  ;;  %v1419_v47 = vcombine.low %v61_v26, %v65_v27  ;;  %v78_v56 = vld [vmem:[%s2403_s0 + $0x1c8] sm:$0xff]  ;;  %v1399_v26 = vcombine.low %v39_v14, %v43_v15 }
  0x20   :  { %1524 = vmatpush3.bf16.msra.mxu0 %v1795_v30  ;;  %v66_v30 = vld [vmem:[%s2403_s0 + $0x168] sm:$0xff] }
  0x21   :  { %1588 = vmatpush3.bf16.msra.mxu1 %v1796_v31  ;;  %1637 = vmatprep.subr.bf16.mxu0 %v1797_v40  ;;  %v1818_v31 = vld [vmem:[%s2402_s1 + $0x128] sm:$0xff]   ;;  %v1422_v37 = vcombine.high %v62_v29, %v66_v30  ;;  %v1823_v40 = vld [vmem:[%s2402_s1 + $0x1f0] sm:$0xff]  }
  0x22   :  { %1701 = vmatprep.subr.bf16.mxu1 %v1799_v42  ;;  %v73_v42 = vld [vmem:[%s2403_s0 + $0x1a0] sm:$0xff]  ;;  %v82_v57 = vld [vmem:[%s2403_s0 + $0x1e8] sm:$0xff] }
  0x23   :  { %957 = vmatmul.mubr.bf16.vlgmr.msra.gmra.mrb[0].mxu0 %v1379_v35  ;;  %v1413_v35 = vcombine.low %v54_v16, %v58_v17  ;;  %v1437_v3 = vcombine.low %v78_v56, %v82_v57  ;;  %v40_v16 = vld [vmem:[%s2403_s0 + $0x98] sm:$0xff] }
  0x24   :  { %1054 = vmatmul.mubr.bf16.vlgmr.msra.gmra.mrb[0].mxu1 %v1381_v38  ;;  %1638 = vmatpush3.bf16.msra.mxu0 %v1798_v41  ;;  %v1821_v38 = vld [vmem:[%s2402_s1 + $0x170] sm:$0xff]   ;;  %v69_v41 = vld [vmem:[%s2403_s0 + $0x180] sm:$0xff]  ;;  %v44_v17 = vld [vmem:[%s2403_s0 + $0xb8] sm:$0xff] }
  0x25   :  { %1702 = vmatpush3.bf16.msra.mxu1 %v1800_v43  ;;  %964 = vmatprep.mubr.bf16.mxu0 %v1388_v46  ;;  %v1824_v43 = vld [vmem:[%s2402_s1 + $0x1b0] sm:$0xff]   ;;  %v1825_v46 = vld [vmem:[%s2402_s1 + $0x178] sm:$0xff]   ;;  %v1427_v58 = vcombine.low %v69_v41, %v73_v42  ;;  %v1401_v27 = vcombine.low %v40_v16, %v44_v17 }
  0x26   :  { %1061 = vmatprep.mubr.bf16.mxu1 %v1390_v49  ;;  %1639 = vmatprep.subr.bf16.mxu0 %v1801_v50  ;;  %v1421_v49 = vcombine.low %v62_v29, %v66_v30  ;;  %v1428_v50 = vcombine.high %v69_v41, %v73_v42  ;;  %v55_v30 = vld [vmem:[%s2403_s0 + $0x110] sm:$0xff]  ;;  %v68_v41 = vld [vmem:[%s2403_s0 + $0x178] sm:$0xff] }
  0x27   :  { %1703 = vmatprep.subr.bf16.mxu1 %v1803_v54  ;;  %v77_v54 = vld [vmem:[%s2403_s0 + $0x1c0] sm:$0xff] }
  0x28   :  { %1640 = vmatpush3.bf16.msra.mxu0 %v1802_v52  ;;  %v1430_v52 = vcombine.high %v70_v44, %v74_v45 }
  0x29   :  { %1704 = vmatpush3.bf16.msra.mxu1 %v1804_v55  ;;  %1641 = vmatprep.subr.bf16.mxu0 %v1805_v62  ;;  %v81_v55 = vld [vmem:[%s2403_s0 + $0x1e0] sm:$0xff]  ;;  %v23_v62 = vld [vmem:[%s2403_s0 + $0x10] sm:$0xff] }
  0x2a   :  { %1705 = vmatprep.subr.bf16.mxu1 %v1807_v0  ;;  %v24_v0 = vld [vmem:[%s2403_s0 + $0x18] sm:$0xff] }
  0x2b   :  { %965 = vmatmul.mubr.bf16.gmra.mrb[4].mxu0 %v1387_v51  ;;  %v1827_v51 = vld [vmem:[%s2402_s1 + $0x1f8] sm:$0xff]  }
  0x2c   :  { %1062 = vmatmul.mubr.bf16.gmra.mrb[4].mxu1 %v1389_v53  ;;  %972 = vmatprep.mubr.bf16.mxu0 %v1396_v60  ;;  %v1828_v53 = vld [vmem:[%s2402_s1 + $0x1b8] sm:$0xff]   ;;  %v1436_v60 = vcombine.high %v77_v54, %v81_v55 }
  0x2d   :  { %1069 = vmatprep.mubr.bf16.mxu1 %v1398_v61  ;;  %1642 = vmatpush3.bf16.msra.mxu0 %v1806_v63  ;;  %v1438_v61 = vcombine.high %v78_v56, %v82_v57  ;;  %v27_v63 = vld [vmem:[%s2403_s0 + $0x30] sm:$0xff]  ;;  %v80_v56 = vld [vmem:[%s2403_s0 + $0x1d8] sm:$0xff] }
  0x2e   :  { %1706 = vmatpush3.bf16.msra.mxu1 %v1808_v1  ;;  %1643 = vmatprep.subr.bf16.mxu0 %v1809_v10  ;;  %v28_v1 = vld [vmem:[%s2403_s0 + $0x38] sm:$0xff]  ;;  %v1384_v4 = vcombine.high %v23_v62, %v27_v63  ;;  %v1383_v10 = vcombine.low %v23_v62, %v27_v63 }
  0x2f   :  { %1707 = vmatprep.subr.bf16.mxu1 %v1811_v12  ;;  %v1386_v5 = vcombine.high %v24_v0, %v28_v1  ;;  %v84_v57 = vld [vmem:[%s2403_s0 + $0x1f8] sm:$0xff] }
  0x30   :  { %v1441_v63 = vcombine.low %v80_v56, %v84_v57 }
  0x31   :  { %1644 = vmatpush3.bf16.msra.mxu0 %v1810_v11  ;;  %v1385_v11 = vcombine.low %v24_v0, %v28_v1 }
  0x32   :  { %1708 = vmatpush3.bf16.msra.mxu1 %v1812_v13  ;;  %1645 = vmatprep.subr.bf16.mxu0 %v1813_v18 }
  0x33   :  { %973 = vmatmul.mubr.bf16.gmra.mrb[8].mxu0 %v1395_v2  ;;  %1709 = vmatprep.subr.bf16.mxu1 %v1815_v23  ;;  %v1435_v2 = vcombine.low %v77_v54, %v81_v55  ;;  %v51_v23 = vld [vmem:[%s2403_s0 + $0xf0] sm:$0xff] }
  0x34   :  { %1070 = vmatmul.mubr.bf16.gmra.mrb[8].mxu1 %v1397_v6  ;;  %980 = vmatprep.mubr.bf16.mxu0 %v1404_v7  ;;  %v31_v6 = vld [vmem:[%s2403_s0 + $0x50] sm:$0xff] }
  0x35   :  { %1077 = vmatprep.mubr.bf16.mxu1 %v1406_v9  ;;  %1646 = vmatpush3.bf16.msra.mxu0 %v1814_v20  ;;  %v35_v7 = vld [vmem:[%s2403_s0 + $0x70] sm:$0xff]  ;;  %v36_v9 = vld [vmem:[%s2403_s0 + $0x78] sm:$0xff]  ;;  %v1400_v20 = vcombine.high %v39_v14, %v43_v15 }
  0x36   :  { %1710 = vmatpush3.bf16.msra.mxu1 %v1816_v25  ;;  %1647 = vmatprep.subr.bf16.mxu0 %v1817_v28  ;;  %v1392_v12 = vcombine.high %v31_v6, %v35_v7  ;;  %v1394_v13 = vcombine.high %v32_v8, %v36_v9  ;;  %v1391_v18 = vcombine.low %v31_v6, %v35_v7  ;;  %v52_v25 = vld [vmem:[%s2403_s0 + $0xf8] sm:$0xff]  ;;  %v79_v54 = vld [vmem:[%s2403_s0 + $0x1d0] sm:$0xff] }
  0x37   :  { %1711 = vmatprep.subr.bf16.mxu1 %v1819_v32  ;;  %v56_v32 = vld [vmem:[%s2403_s0 + $0x118] sm:$0xff]  ;;  %v83_v55 = vld [vmem:[%s2403_s0 + $0x1f0] sm:$0xff] }
  0x38   :  { %v1439_v62 = vcombine.low %v79_v54, %v83_v55 }
  0x39   :  { %1648 = vmatpush3.bf16.msra.mxu0 %v1818_v31  ;;  %v59_v31 = vld [vmem:[%s2403_s0 + $0x130] sm:$0xff] }
  0x3a   :  { %1712 = vmatpush3.bf16.msra.mxu1 %v1820_v33  ;;  %1649 = vmatprep.subr.bf16.mxu0 %v1821_v38  ;;  %v60_v33 = vld [vmem:[%s2403_s0 + $0x138] sm:$0xff]  ;;  %v63_v38 = vld [vmem:[%s2403_s0 + $0x150] sm:$0xff]  ;;  %v1415_v42 = vcombine.low %v55_v30, %v59_v31 }
  0x3b   :  { %981 = vmatmul.mubr.bf16.gmra.mrb[12].mxu0 %v1403_v19  ;;  %1713 = vmatprep.subr.bf16.mxu1 %v1823_v40  ;;  %v1393_v19 = vcombine.low %v32_v8, %v36_v9  ;;  %v64_v40 = vld [vmem:[%s2403_s0 + $0x158] sm:$0xff] }
  0x3c   :  { %1078 = vmatmul.mubr.bf16.gmra.mrb[12].mxu1 %v1405_v21  ;;  %988 = vmatprep.mubr.bf16.mxu0 %v1412_v22  ;;  %v1402_v21 = vcombine.high %v40_v16, %v44_v17  ;;  %v47_v22 = vld [vmem:[%s2403_s0 + $0xd0] sm:$0xff]  ;;  %v1426_v45 = vcombine.high %v64_v40, %v68_v41 }
  0x3d   :  { %1085 = vmatprep.mubr.bf16.mxu1 %v1414_v24  ;;  %1650 = vmatpush3.bf16.msra.mxu0 %v1822_v39  ;;  %v48_v24 = vld [vmem:[%s2403_s0 + $0xd8] sm:$0xff]  ;;  %v1408_v28 = vcombine.high %v47_v22, %v51_v23  ;;  %v67_v39 = vld [vmem:[%s2403_s0 + $0x170] sm:$0xff] }
  0x3e   :  { %1714 = vmatpush3.bf16.msra.mxu1 %v1824_v43  ;;  %1651 = vmatprep.subr.bf16.mxu0 %v1825_v46  ;;  %v1410_v29 = vcombine.high %v48_v24, %v52_v25  ;;  %v1417_v43 = vcombine.low %v56_v32, %v60_v33  ;;  %v1424_v44 = vcombine.high %v63_v38, %v67_v39  ;;  %v71_v46 = vld [vmem:[%s2403_s0 + $0x190] sm:$0xff] }
  0x3f   :  { %1715 = vmatprep.subr.bf16.mxu1 %v1827_v51  ;;  %v1425_v51 = vcombine.low %v64_v40, %v68_v41 }
  0x41   :  { %1652 = vmatpush3.bf16.msra.mxu0 %v1826_v48  ;;  %v72_v48 = vld [vmem:[%s2403_s0 + $0x198] sm:$0xff] }
  0x42   :  { %1716 = vmatpush3.bf16.msra.mxu1 %v1828_v53 }
  0x43   :  { %989 = vmatmul.mubr.bf16.gmra.mrb[16].mxu0 %v1411_v34  ;;  %v1407_v34 = vcombine.low %v47_v22, %v51_v23 }
  0x44   :  { %1086 = vmatmul.mubr.bf16.gmra.mrb[16].mxu1 %v1413_v35  ;;  %996 = vmatprep.mubr.bf16.mxu0 %v1420_v36  ;;  %v1409_v35 = vcombine.low %v48_v24, %v52_v25  ;;  %v1416_v36 = vcombine.high %v55_v30, %v59_v31 }
  0x45   :  { %1093 = vmatprep.mubr.bf16.mxu1 %v1422_v37  ;;  %v1418_v37 = vcombine.high %v56_v32, %v60_v33 }
  0x4b   :  { %997 = vmatmul.mubr.bf16.gmra.mrb[20].mxu0 %v1419_v47  ;;  %v75_v47 = vld [vmem:[%s2403_s0 + $0x1b0] sm:$0xff] }
  0x4c   :  { %1094 = vmatmul.mubr.bf16.gmra.mrb[20].mxu1 %v1421_v49  ;;  %1004 = vmatprep.mubr.bf16.mxu0 %v1428_v50  ;;  %v76_v49 = vld [vmem:[%s2403_s0 + $0x1b8] sm:$0xff]  ;;  %v1423_v50 = vcombine.low %v63_v38, %v67_v39 }
  0x4d   :  { %1101 = vmatprep.mubr.bf16.mxu1 %v1430_v52  ;;  %v1432_v52 = vcombine.high %v71_v46, %v75_v47  ;;  %v1434_v53 = vcombine.high %v72_v48, %v76_v49 }
  0x53   :  { %1005 = vmatmul.mubr.bf16.gmra.mrb[24].mxu0 %v1427_v58  ;;  %v1431_v58 = vcombine.low %v71_v46, %v75_v47 }
  0x54   :  { %1102 = vmatmul.mubr.bf16.gmra.mrb[24].mxu1 %v1429_v59  ;;  %1012 = vmatprep.mubr.bf16.mxu0 %v1436_v60  ;;  %v1433_v59 = vcombine.low %v72_v48, %v76_v49  ;;  %v1440_v60 = vcombine.high %v79_v54, %v83_v55 }
  0x55   :  { %1109 = vmatprep.mubr.bf16.mxu1 %v1438_v61  ;;  %v1442_v61 = vcombine.high %v80_v56, %v84_v57 }
  0x5b   :  { %1013 = vmatmul.mubr.bf16.gmra.mrb[28].mxu0 %v1435_v2  ;;  %v2246_v2 = vld [vmem:[%s2404_s2] ss:$0 sm:$0xff] }
  0x5c   :  { %1110 = vmatmul.mubr.bf16.gmra.mrb[28].mxu1 %v1437_v3  ;;  %1150 = vmatprep.mubr.bf16.mxu0 %v1384_v4 }
  0x5d   :  { %1247 = vmatprep.mubr.bf16.mxu1 %v1386_v5 }
  0x63   :  { %1151 = vmatmul.mubr.bf16.vlgmr.msra.gmra.mrb[32].mxu0 %v1383_v10 }
  0x64   :  { %1248 = vmatmul.mubr.bf16.vlgmr.msra.gmra.mrb[32].mxu1 %v1385_v11  ;;  %1158 = vmatprep.mubr.bf16.mxu0 %v1392_v12 }
  0x65   :  { %1255 = vmatprep.mubr.bf16.mxu1 %v1394_v13 }
  0x6b   :  { %1159 = vmatmul.mubr.bf16.gmra.mrb[36].mxu0 %v1391_v18 }
  0x6c   :  { %1256 = vmatmul.mubr.bf16.gmra.mrb[36].mxu1 %v1393_v19  ;;  %1166 = vmatprep.mubr.bf16.mxu0 %v1400_v20 }
  0x6d   :  { %1263 = vmatprep.mubr.bf16.mxu1 %v1402_v21 }
  0x73   :  { %1167 = vmatmul.mubr.bf16.gmra.mrb[40].mxu0 %v1399_v26 }
  0x74   :  { %1264 = vmatmul.mubr.bf16.gmra.mrb[40].mxu1 %v1401_v27  ;;  %1174 = vmatprep.mubr.bf16.mxu0 %v1408_v28 }
  0x75   :  { %1271 = vmatprep.mubr.bf16.mxu1 %v1410_v29 }
  0x7b   :  { %1175 = vmatmul.mubr.bf16.gmra.mrb[44].mxu0 %v1407_v34 }
  0x7c   :  { %1272 = vmatmul.mubr.bf16.gmra.mrb[44].mxu1 %v1409_v35  ;;  %1182 = vmatprep.mubr.bf16.mxu0 %v1416_v36 }
  0x7d   :  { %1279 = vmatprep.mubr.bf16.mxu1 %v1418_v37 }
  0x83   :  { %1183 = vmatmul.mubr.bf16.gmra.mrb[48].mxu0 %v1415_v42 }
  0x84   :  { %1280 = vmatmul.mubr.bf16.gmra.mrb[48].mxu1 %v1417_v43  ;;  %1190 = vmatprep.mubr.bf16.mxu0 %v1424_v44 }
  0x85   :  { %1287 = vmatprep.mubr.bf16.mxu1 %v1426_v45 }
  0x8b   :  { %1191 = vmatmul.mubr.bf16.gmra.mrb[52].mxu0 %v1423_v50 }
  0x8c   :  { %1288 = vmatmul.mubr.bf16.gmra.mrb[52].mxu1 %v1425_v51  ;;  %1198 = vmatprep.mubr.bf16.mxu0 %v1432_v52 }
  0x8d   :  { %1295 = vmatprep.mubr.bf16.mxu1 %v1434_v53 }
  0x93   :  { %1199 = vmatmul.mubr.bf16.gmra.mrb[56].mxu0 %v1431_v58 }
  0x94   :  { %1296 = vmatmul.mubr.bf16.gmra.mrb[56].mxu1 %v1433_v59  ;;  %1206 = vmatprep.mubr.bf16.mxu0 %v1440_v60 }
  0x95   :  { %1303 = vmatprep.mubr.bf16.mxu1 %v1442_v61 }
  0x9b   :  { %1207 = vmatmul.mubr.bf16.gmra.mrb[60].mxu0 %v1439_v62 }
  0x9c   :  { %1304 = vmatmul.mubr.bf16.gmra.mrb[60].mxu1 %v1441_v63 }
  0xf6   :  { %v1525_v0 = vpop.f32.mrb[0].mxu0 }
  0xf7   :  { %v1589_v1 = vpop.f32.mrb[0].mxu1  ;;  %v1526_v3 = vpop.f32.mrb[1].mxu0 }
  0xf8   :  { %v1527_v4 = vadd.f32 %v1526_v3, %v1525_v0  ;;  %v1590_v5 = vpop.f32.mrb[1].mxu1  ;;  %v1528_v6 = vpop.f32.mrb[2].mxu0 }
  0xf9   :  { %v1591_v7 = vadd.f32 %v1590_v5, %v1589_v1  ;;  %v1592_v8 = vpop.f32.mrb[2].mxu1  ;;  %v1529_v9 = vpop.f32.mrb[3].mxu0 }
  0xfa   :  { %v959_v10 = vadd.f32 %v1527_v4, %v2246_v2  ;;  %v1530_v11 = vadd.f32 %v1529_v9, %v1528_v6  ;;  %v1593_v12 = vpop.f32.mrb[3].mxu1 }
  0xfb   :  { %v1594_v13 = vadd.f32 %v1593_v12, %v1592_v8 }
  0xfc   :  { %v2249_v14 = vadd.f32 %v1591_v7, %v959_v10  ;;  %v962_v15 = vadd.f32 %v1530_v11, %v2246_v2 }
  0xfe   :  { %v2252_v16 = vadd.f32 %v1594_v13, %v962_v15  ;;  %v1531_v17 = vpop.f32.mrb[4].mxu0 }
  0xff   :  { %v1595_v18 = vpop.f32.mrb[4].mxu1  ;;  %v1532_v19 = vpop.f32.mrb[5].mxu0 }
 0x100   :  { %v1533_v20 = vadd.f32 %v1532_v19, %v1531_v17  ;;  %v1596_v21 = vpop.f32.mrb[5].mxu1  ;;  %v1534_v22 = vpop.f32.mrb[6].mxu0 }
 0x101   :  { %v1597_v23 = vadd.f32 %v1596_v21, %v1595_v18  ;;  %v1598_v24 = vpop.f32.mrb[6].mxu1  ;;  %v1535_v25 = vpop.f32.mrb[7].mxu0 }
 0x102   :  { %v967_v26 = vadd.f32 %v1533_v20, %v2246_v2  ;;  %v1536_v27 = vadd.f32 %v1535_v25, %v1534_v22  ;;  %v1599_v28 = vpop.f32.mrb[7].mxu1 }
 0x103   :  { %v1600_v29 = vadd.f32 %v1599_v28, %v1598_v24 }
 0x104   :  { %v2255_v30 = vadd.f32 %v1597_v23, %v967_v26  ;;  %v970_v31 = vadd.f32 %v1536_v27, %v2246_v2 }
 0x106   :  { %v2258_v32 = vadd.f32 %v1600_v29, %v970_v31  ;;  %v1537_v33 = vpop.f32.mrb[8].mxu0 }
 0x107   :  { %v1601_v34 = vpop.f32.mrb[8].mxu1  ;;  %v1538_v35 = vpop.f32.mrb[9].mxu0 }
 0x108   :  { %v1539_v36 = vadd.f32 %v1538_v35, %v1537_v33  ;;  %v1602_v37 = vpop.f32.mrb[9].mxu1  ;;  %v1540_v38 = vpop.f32.mrb[10].mxu0 }
 0x109   :  { %v1603_v39 = vadd.f32 %v1602_v37, %v1601_v34  ;;  %v1604_v40 = vpop.f32.mrb[10].mxu1  ;;  %v1541_v41 = vpop.f32.mrb[11].mxu0 }
 0x10a   :  { %v975_v42 = vadd.f32 %v1539_v36, %v2246_v2  ;;  %v1542_v43 = vadd.f32 %v1541_v41, %v1540_v38  ;;  %v1605_v44 = vpop.f32.mrb[11].mxu1 }
 0x10b   :  { %v1606_v45 = vadd.f32 %v1605_v44, %v1604_v40 }
 0x10c   :  { %v2261_v46 = vadd.f32 %v1603_v39, %v975_v42  ;;  %v978_v47 = vadd.f32 %v1542_v43, %v2246_v2 }
 0x10e   :  { %v2264_v48 = vadd.f32 %v1606_v45, %v978_v47  ;;  %v1543_v49 = vpop.f32.mrb[12].mxu0 }
 0x10f   :  { %v1607_v50 = vpop.f32.mrb[12].mxu1  ;;  %v1544_v51 = vpop.f32.mrb[13].mxu0 }
 0x110   :  { %v1545_v52 = vadd.f32 %v1544_v51, %v1543_v49  ;;  %v1608_v53 = vpop.f32.mrb[13].mxu1  ;;  %v1546_v54 = vpop.f32.mrb[14].mxu0 }
 0x111   :  { %v1609_v55 = vadd.f32 %v1608_v53, %v1607_v50  ;;  %v1610_v56 = vpop.f32.mrb[14].mxu1  ;;  %v1547_v57 = vpop.f32.mrb[15].mxu0 }
 0x112   :  { %v983_v58 = vadd.f32 %v1545_v52, %v2246_v2  ;;  %v1548_v59 = vadd.f32 %v1547_v57, %v1546_v54  ;;  %v1611_v60 = vpop.f32.mrb[15].mxu1 }
 0x113   :  { %v1612_v61 = vadd.f32 %v1611_v60, %v1610_v56 }
 0x114   :  { %v2267_v62 = vadd.f32 %v1609_v55, %v983_v58  ;;  %v986_v63 = vadd.f32 %v1548_v59, %v2246_v2 }
 0x116   :  { %v2270_v0 = vadd.f32 %v1612_v61, %v986_v63  ;;  %v1549_v1 = vpop.f32.mrb[16].mxu0 }
 0x117   :  { %v1613_v3 = vpop.f32.mrb[16].mxu1  ;;  %v1550_v4 = vpop.f32.mrb[17].mxu0 }
 0x118   :  { %v1551_v5 = vadd.f32 %v1550_v4, %v1549_v1  ;;  %v1614_v6 = vpop.f32.mrb[17].mxu1  ;;  %v1552_v7 = vpop.f32.mrb[18].mxu0 }
 0x119   :  { %v1615_v8 = vadd.f32 %v1614_v6, %v1613_v3  ;;  %v1616_v9 = vpop.f32.mrb[18].mxu1  ;;  %v1553_v10 = vpop.f32.mrb[19].mxu0 }
 0x11a   :  { %v991_v11 = vadd.f32 %v1551_v5, %v2246_v2  ;;  %v1554_v12 = vadd.f32 %v1553_v10, %v1552_v7  ;;  %v1617_v13 = vpop.f32.mrb[19].mxu1 }
 0x11b   :  { %v1618_v15 = vadd.f32 %v1617_v13, %v1616_v9 }
 0x11c   :  { %v2273_v17 = vadd.f32 %v1615_v8, %v991_v11  ;;  %v994_v18 = vadd.f32 %v1554_v12, %v2246_v2 }
 0x11e   :  { %v2276_v19 = vadd.f32 %v1618_v15, %v994_v18  ;;  %v1555_v20 = vpop.f32.mrb[20].mxu0 }
 0x11f   :  { %v1619_v21 = vpop.f32.mrb[20].mxu1  ;;  %v1556_v22 = vpop.f32.mrb[21].mxu0 }
 0x120   :  { %v1557_v23 = vadd.f32 %v1556_v22, %v1555_v20  ;;  %v1620_v24 = vpop.f32.mrb[21].mxu1  ;;  %v1558_v25 = vpop.f32.mrb[22].mxu0 }
 0x121   :  { %v1621_v26 = vadd.f32 %v1620_v24, %v1619_v21  ;;  %v1622_v27 = vpop.f32.mrb[22].mxu1  ;;  %v1559_v28 = vpop.f32.mrb[23].mxu0 }
 0x122   :  { %v999_v29 = vadd.f32 %v1557_v23, %v2246_v2  ;;  %v1560_v31 = vadd.f32 %v1559_v28, %v1558_v25  ;;  %v1623_v33 = vpop.f32.mrb[23].mxu1 }
 0x123   :  { %v1624_v34 = vadd.f32 %v1623_v33, %v1622_v27  ;;  %v2300_v27 = vld [vmem:[%s2405_s3] ss:$0 sm:$0xff] }
 0x124   :  { %v2279_v35 = vadd.f32 %v1621_v26, %v999_v29  ;;  %v1002_v36 = vadd.f32 %v1560_v31, %v2246_v2  ;;  %v2306_v31 = vld [vmem:[%s2406_s4] ss:$0 sm:$0xff] }
 0x126   :  { %v2282_v37 = vadd.f32 %v1624_v34, %v1002_v36  ;;  %v1561_v38 = vpop.f32.mrb[24].mxu0 }
 0x127   :  { %v1625_v39 = vpop.f32.mrb[24].mxu1  ;;  %v1562_v40 = vpop.f32.mrb[25].mxu0 }
 0x128   :  { %v1563_v41 = vadd.f32 %v1562_v40, %v1561_v38  ;;  %v1626_v42 = vpop.f32.mrb[25].mxu1  ;;  %v1564_v43 = vpop.f32.mrb[26].mxu0 }
 0x129   :  { %v1627_v44 = vadd.f32 %v1626_v42, %v1625_v39  ;;  %v1628_v45 = vpop.f32.mrb[26].mxu1  ;;  %v1565_v47 = vpop.f32.mrb[27].mxu0 }
 0x12a   :  { %v1007_v49 = vadd.f32 %v1563_v41, %v2246_v2  ;;  %v1566_v50 = vadd.f32 %v1565_v47, %v1564_v43  ;;  %v1629_v51 = vpop.f32.mrb[27].mxu1 }
 0x12b   :  { %v1630_v52 = vadd.f32 %v1629_v51, %v1628_v45 }
 0x12c   :  { %v2285_v53 = vadd.f32 %v1627_v44, %v1007_v49  ;;  %v1010_v54 = vadd.f32 %v1566_v50, %v2246_v2 }
 0x12e   :  { %v2288_v55 = vadd.f32 %v1630_v52, %v1010_v54  ;;  %v1567_v56 = vpop.f32.mrb[28].mxu0 }
 0x12f   :  { %v1631_v57 = vpop.f32.mrb[28].mxu1  ;;  %v1568_v58 = vpop.f32.mrb[29].mxu0 }
 0x130   :  { %v1569_v59 = vadd.f32 %v1568_v58, %v1567_v56  ;;  %v1632_v60 = vpop.f32.mrb[29].mxu1  ;;  %v1570_v61 = vpop.f32.mrb[30].mxu0 }
 0x131   :  { %v1633_v63 = vadd.f32 %v1632_v60, %v1631_v57  ;;  %v1634_v1 = vpop.f32.mrb[30].mxu1  ;;  %v1571_v3 = vpop.f32.mrb[31].mxu0 }
 0x132   :  { %v1015_v4 = vadd.f32 %v1569_v59, %v2246_v2  ;;  %v1572_v5 = vadd.f32 %v1571_v3, %v1570_v61  ;;  %v1635_v6 = vpop.f32.mrb[31].mxu1 }
 0x133   :  { %v1636_v7 = vadd.f32 %v1635_v6, %v1634_v1 }
 0x134   :  { %v2291_v8 = vadd.f32 %v1633_v63, %v1015_v4  ;;  %v1018_v9 = vadd.f32 %v1572_v5, %v2246_v2 }
 0x136   :  { %v2294_v10 = vadd.f32 %v1636_v7, %v1018_v9  ;;  %v1653_v11 = vpop.f32.mrb[32].mxu0 }
 0x137   :  { %v1717_v12 = vpop.f32.mrb[32].mxu1  ;;  %v1654_v13 = vpop.f32.mrb[33].mxu0 }
 0x138   :  { %v1655_v15 = vadd.f32 %v1654_v13, %v1653_v11  ;;  %v1718_v18 = vpop.f32.mrb[33].mxu1  ;;  %v1656_v20 = vpop.f32.mrb[34].mxu0 }
 0x139   :  { %v1719_v21 = vadd.f32 %v1718_v18, %v1717_v12  ;;  %v1720_v22 = vpop.f32.mrb[34].mxu1  ;;  %v1657_v23 = vpop.f32.mrb[35].mxu0 }
 0x13a   :  { %v1153_v24 = vadd.f32 %v1655_v15, %v2249_v14  ;;  %v1658_v25 = vadd.f32 %v1657_v23, %v1656_v20  ;;  %v1721_v26 = vpop.f32.mrb[35].mxu1 }
 0x13b   :  { %v1722_v2 = vadd.f32 %v1721_v26, %v1720_v22 }
 0x13c   :  { %v1250_v28 = vadd.f32 %v1719_v21, %v1153_v24  ;;  %v1156_v29 = vadd.f32 %v1658_v25, %v2252_v16 }
 0x13e   :  { %v1319_v33 = vmul.f32 %v2300_v27, %v1250_v28  ;;  %v1253_v34 = vadd.f32 %v1722_v2, %v1156_v29  ;;  %v1659_v14 = vpop.f32.mrb[36].mxu0 }
 0x13f   :  { %v1723_v36 = vpop.f32.mrb[36].mxu1  ;;  %v1660_v38 = vpop.f32.mrb[37].mxu0 }
 0x140   :  { %v1342_v39 = vadd.f32 %v2306_v31, %v1319_v33  ;;  %v1320_v40 = vmul.f32 %v2300_v27, %v1253_v34  ;;  %v1661_v41 = vadd.f32 %v1660_v38, %v1659_v14  ;;  %v1724_v42 = vpop.f32.mrb[37].mxu1  ;;  %v1662_v43 = vpop.f32.mrb[38].mxu0 }
 0x141   :  { %v1725_v44 = vadd.f32 %v1724_v42, %v1723_v36  ;;  %v1726_v16 = vpop.f32.mrb[38].mxu1  ;;  %v1663_v45 = vpop.f32.mrb[39].mxu0 }
 0x142   :  { %1358 = vst [vmem:[%s2407_s5] sm:$0xff] %v1342_v39  ;;  %v1343_v47 = vadd.f32 %v2306_v31, %v1320_v40  ;;  %v1161_v49 = vadd.f32 %v1661_v41, %v2255_v30  ;;  %v1664_v50 = vadd.f32 %v1663_v45, %v1662_v43  ;;  %v1727_v51 = vpop.f32.mrb[39].mxu1 }
 0x143   :  { %v1728_v52 = vadd.f32 %v1727_v51, %v1726_v16 }
 0x144   :  { %1359 = vst [vmem:[%s2407_s5 + $0x8] sm:$0xff] %v1343_v47  ;;  %v1258_v54 = vadd.f32 %v1725_v44, %v1161_v49  ;;  %v1164_v56 = vadd.f32 %v1664_v50, %v2258_v32 }
 0x146   :  { %v1321_v57 = vmul.f32 %v2300_v27, %v1258_v54  ;;  %v1261_v58 = vadd.f32 %v1728_v52, %v1164_v56  ;;  %v1665_v59 = vpop.f32.mrb[40].mxu0 }
 0x147   :  { %v1729_v60 = vpop.f32.mrb[40].mxu1  ;;  %v1666_v61 = vpop.f32.mrb[41].mxu0 }
 0x148   :  { %v1344_v63 = vadd.f32 %v2306_v31, %v1321_v57  ;;  %v1322_v30 = vmul.f32 %v2300_v27, %v1261_v58  ;;  %v1667_v1 = vadd.f32 %v1666_v61, %v1665_v59  ;;  %v1730_v3 = vpop.f32.mrb[41].mxu1  ;;  %v1668_v4 = vpop.f32.mrb[42].mxu0 }
 0x149   :  { %v1731_v5 = vadd.f32 %v1730_v3, %v1729_v60  ;;  %v1732_v6 = vpop.f32.mrb[42].mxu1  ;;  %v1669_v7 = vpop.f32.mrb[43].mxu0 }
 0x14a   :  { %1360 = vst [vmem:[%s2407_s5 + $0x10] sm:$0xff] %v1344_v63  ;;  %v1345_v32 = vadd.f32 %v2306_v31, %v1322_v30  ;;  %v1169_v9 = vadd.f32 %v1667_v1, %v2261_v46  ;;  %v1670_v11 = vadd.f32 %v1669_v7, %v1668_v4  ;;  %v1733_v12 = vpop.f32.mrb[43].mxu1 }
 0x14b   :  { %v1734_v13 = vadd.f32 %v1733_v12, %v1732_v6 }
 0x14c   :  { %1361 = vst [vmem:[%s2407_s5 + $0x18] sm:$0xff] %v1345_v32  ;;  %v1266_v15 = vadd.f32 %v1731_v5, %v1169_v9  ;;  %v1172_v18 = vadd.f32 %v1670_v11, %v2264_v48 }
 0x14e   :  { %v1323_v20 = vmul.f32 %v2300_v27, %v1266_v15  ;;  %v1269_v21 = vadd.f32 %v1734_v13, %v1172_v18  ;;  %v1671_v22 = vpop.f32.mrb[44].mxu0 }
 0x14f   :  { %v1735_v23 = vpop.f32.mrb[44].mxu1  ;;  %v1672_v24 = vpop.f32.mrb[45].mxu0 }
 0x150   :  { %v1346_v25 = vadd.f32 %v2306_v31, %v1323_v20  ;;  %v1324_v46 = vmul.f32 %v2300_v27, %v1269_v21  ;;  %v1673_v26 = vadd.f32 %v1672_v24, %v1671_v22  ;;  %v1736_v2 = vpop.f32.mrb[45].mxu1  ;;  %v1674_v28 = vpop.f32.mrb[46].mxu0 }
 0x151   :  { %v1737_v29 = vadd.f32 %v1736_v2, %v1735_v23  ;;  %v1738_v33 = vpop.f32.mrb[46].mxu1  ;;  %v1675_v34 = vpop.f32.mrb[47].mxu0 }
 0x152   :  { %1362 = vst [vmem:[%s2407_s5 + $0x20] sm:$0xff] %v1346_v25  ;;  %v1347_v48 = vadd.f32 %v2306_v31, %v1324_v46  ;;  %v1177_v14 = vadd.f32 %v1673_v26, %v2267_v62  ;;  %v1676_v36 = vadd.f32 %v1675_v34, %v1674_v28  ;;  %v1739_v38 = vpop.f32.mrb[47].mxu1 }
 0x153   :  { %v1740_v39 = vadd.f32 %v1739_v38, %v1738_v33 }
 0x154   :  { %1363 = vst [vmem:[%s2407_s5 + $0x28] sm:$0xff] %v1347_v48  ;;  %v1274_v40 = vadd.f32 %v1737_v29, %v1177_v14  ;;  %v1180_v41 = vadd.f32 %v1676_v36, %v2270_v0 }
 0x156   :  { %v1325_v42 = vmul.f32 %v2300_v27, %v1274_v40  ;;  %v1277_v43 = vadd.f32 %v1740_v39, %v1180_v41  ;;  %v1677_v44 = vpop.f32.mrb[48].mxu0 }
 0x157   :  { %v1741_v16 = vpop.f32.mrb[48].mxu1  ;;  %v1678_v45 = vpop.f32.mrb[49].mxu0 }
 0x158   :  { %v1348_v47 = vadd.f32 %v2306_v31, %v1325_v42  ;;  %v1326_v62 = vmul.f32 %v2300_v27, %v1277_v43  ;;  %v1679_v49 = vadd.f32 %v1678_v45, %v1677_v44  ;;  %v1742_v50 = vpop.f32.mrb[49].mxu1  ;;  %v1680_v51 = vpop.f32.mrb[50].mxu0 }
 0x159   :  { %v1743_v52 = vadd.f32 %v1742_v50, %v1741_v16  ;;  %v1744_v54 = vpop.f32.mrb[50].mxu1  ;;  %v1681_v56 = vpop.f32.mrb[51].mxu0 }
 0x15a   :  { %1364 = vst [vmem:[%s2407_s5 + $0x30] sm:$0xff] %v1348_v47  ;;  %v1349_v0 = vadd.f32 %v2306_v31, %v1326_v62  ;;  %v1185_v57 = vadd.f32 %v1679_v49, %v2273_v17  ;;  %v1682_v58 = vadd.f32 %v1681_v56, %v1680_v51  ;;  %v1745_v59 = vpop.f32.mrb[51].mxu1 }
 0x15b   :  { %v1746_v60 = vadd.f32 %v1745_v59, %v1744_v54 }
 0x15c   :  { %1365 = vst [vmem:[%s2407_s5 + $0x38] sm:$0xff] %v1349_v0  ;;  %v1282_v61 = vadd.f32 %v1743_v52, %v1185_v57  ;;  %v1188_v63 = vadd.f32 %v1682_v58, %v2276_v19 }
 0x15e   :  { %v1327_v30 = vmul.f32 %v2300_v27, %v1282_v61  ;;  %v1285_v1 = vadd.f32 %v1746_v60, %v1188_v63  ;;  %v1683_v3 = vpop.f32.mrb[52].mxu0 }
 0x15f   :  { %v1747_v4 = vpop.f32.mrb[52].mxu1  ;;  %v1684_v5 = vpop.f32.mrb[53].mxu0 }
 0x160   :  { %v1350_v6 = vadd.f32 %v2306_v31, %v1327_v30  ;;  %v1328_v17 = vmul.f32 %v2300_v27, %v1285_v1  ;;  %v1685_v7 = vadd.f32 %v1684_v5, %v1683_v3  ;;  %v1748_v32 = vpop.f32.mrb[53].mxu1  ;;  %v1686_v9 = vpop.f32.mrb[54].mxu0 }
 0x161   :  { %v1749_v11 = vadd.f32 %v1748_v32, %v1747_v4  ;;  %v1750_v12 = vpop.f32.mrb[54].mxu1  ;;  %v1687_v13 = vpop.f32.mrb[55].mxu0 }
 0x162   :  { %1366 = vst [vmem:[%s2407_s5 + $0x40] sm:$0xff] %v1350_v6  ;;  %v1351_v19 = vadd.f32 %v2306_v31, %v1328_v17  ;;  %v1193_v15 = vadd.f32 %v1685_v7, %v2279_v35  ;;  %v1688_v18 = vadd.f32 %v1687_v13, %v1686_v9  ;;  %v1751_v20 = vpop.f32.mrb[55].mxu1 }
 0x163   :  { %v1752_v21 = vadd.f32 %v1751_v20, %v1750_v12 }
 0x164   :  { %1367 = vst [vmem:[%s2407_s5 + $0x48] sm:$0xff] %v1351_v19  ;;  %v1290_v22 = vadd.f32 %v1749_v11, %v1193_v15  ;;  %v1196_v23 = vadd.f32 %v1688_v18, %v2282_v37 }
 0x166   :  { %v1329_v24 = vmul.f32 %v2300_v27, %v1290_v22  ;;  %v1293_v25 = vadd.f32 %v1752_v21, %v1196_v23  ;;  %v1689_v46 = vpop.f32.mrb[56].mxu0 }
 0x167   :  { %v1753_v26 = vpop.f32.mrb[56].mxu1  ;;  %v1690_v2 = vpop.f32.mrb[57].mxu0 }
 0x168   :  { %v1352_v28 = vadd.f32 %v2306_v31, %v1329_v24  ;;  %v1330_v35 = vmul.f32 %v2300_v27, %v1293_v25  ;;  %v1691_v29 = vadd.f32 %v1690_v2, %v1689_v46  ;;  %v1754_v33 = vpop.f32.mrb[57].mxu1  ;;  %v1692_v34 = vpop.f32.mrb[58].mxu0 }
 0x169   :  { %v1755_v48 = vadd.f32 %v1754_v33, %v1753_v26  ;;  %v1756_v14 = vpop.f32.mrb[58].mxu1  ;;  %v1693_v36 = vpop.f32.mrb[59].mxu0 }
 0x16a   :  { %1368 = vst [vmem:[%s2407_s5 + $0x50] sm:$0xff] %v1352_v28  ;;  %v1353_v37 = vadd.f32 %v2306_v31, %v1330_v35  ;;  %v1201_v38 = vadd.f32 %v1691_v29, %v2285_v53  ;;  %v1694_v39 = vadd.f32 %v1693_v36, %v1692_v34  ;;  %v1757_v40 = vpop.f32.mrb[59].mxu1 }
 0x16b   :  { %v1758_v41 = vadd.f32 %v1757_v40, %v1756_v14 }
 0x16c   :  { %1369 = vst [vmem:[%s2407_s5 + $0x58] sm:$0xff] %v1353_v37  ;;  %v1298_v42 = vadd.f32 %v1755_v48, %v1201_v38  ;;  %v1204_v43 = vadd.f32 %v1694_v39, %v2288_v55 }
 0x16e   :  { %v1331_v44 = vmul.f32 %v2300_v27, %v1298_v42  ;;  %v1301_v16 = vadd.f32 %v1758_v41, %v1204_v43  ;;  %v1695_v45 = vpop.f32.mrb[60].mxu0 }
 0x16f   :  { %v1759_v47 = vpop.f32.mrb[60].mxu1  ;;  %v1696_v62 = vpop.f32.mrb[61].mxu0 }
 0x170   :  { %v1354_v49 = vadd.f32 %v2306_v31, %v1331_v44  ;;  %v1332_v53 = vmul.f32 %v2300_v27, %v1301_v16  ;;  %v1697_v50 = vadd.f32 %v1696_v62, %v1695_v45  ;;  %v1760_v51 = vpop.f32.mrb[61].mxu1  ;;  %v1698_v52 = vpop.f32.mrb[62].mxu0 }
 0x171   :  { %v1761_v54 = vadd.f32 %v1760_v51, %v1759_v47  ;;  %v1762_v56 = vpop.f32.mrb[62].mxu1  ;;  %v1699_v0 = vpop.f32.mrb[63].mxu0 }
 0x172   :  { %1370 = vst [vmem:[%s2407_s5 + $0x60] sm:$0xff] %v1354_v49  ;;  %v1355_v55 = vadd.f32 %v2306_v31, %v1332_v53  ;;  %v1209_v57 = vadd.f32 %v1697_v50, %v2291_v8  ;;  %v1700_v58 = vadd.f32 %v1699_v0, %v1698_v52  ;;  %v1763_v59 = vpop.f32.mrb[63].mxu1 }
 0x173   :  { %v1764_v60 = vadd.f32 %v1763_v59, %v1762_v56 }
 0x174   :  { %1371 = vst [vmem:[%s2407_s5 + $0x68] sm:$0xff] %v1355_v55  ;;  %v1306_v61 = vadd.f32 %v1761_v54, %v1209_v57  ;;  %v1212_v63 = vadd.f32 %v1700_v58, %v2294_v10 }
 0x176   :  { %v1333_v30 = vmul.f32 %v2300_v27, %v1306_v61  ;;  %v1309_v1 = vadd.f32 %v1764_v60, %v1212_v63 }
 0x178   :  { %v1356_v3 = vadd.f32 %v2306_v31, %v1333_v30  ;;  %v1334_v4 = vmul.f32 %v2300_v27, %v1309_v1 }
 0x17a   :  { %1372 = vst [vmem:[%s2407_s5 + $0x70] sm:$0xff] %v1356_v3  ;;  %v1357_v8 = vadd.f32 %v2306_v31, %v1334_v4 }
 0x17c   :  { %1373 = vst [vmem:[%s2407_s5 + $0x78] sm:$0xff] %v1357_v8 }

// kernel: relation_feature_extractor_forward.9
= control target key start
LH: loop header
LB: loop body
LE: loop exit
PB: predicated region body
PF: predicated region fallthrough
CT: control target
= control target key end

     0   :  { %v465_v2 = vmov 0.0   ;;  %s614_s0 = inlined_call_operand.vmem [shape: f32[8,256], index: 0, kind: input, shape index: {}]   ;;  %s615_s1 = inlined_call_operand.vmem [shape: f32[8,256], index: 1, kind: input, shape index: {}]   ;;  %s616_s2 = inlined_call_operand.vmem [shape: bf16[256,128], index: 2, kind: input, shape index: {}]   ;;  %s617_s3 = inlined_call_operand.vmem [shape: f32[1,128], index: 3, kind: input, shape index: {}]   ;;  %s618_s4 = inlined_call_operand.vmem [shape: bf16[128,128], index: 4, kind: input, shape index: {}]   ;;  %s619_s5 = inlined_call_operand.vmem [shape: f32[1,128], index: 5, kind: input, shape index: {}]   ;;  %s620_s6 = inlined_call_operand.hbm [shape: f32[8,128], index: 6, kind: output, shape index: {}]  }
   0x1   :  { %v417_v0 = vld [vmem:[%s616_s2 + $0x40] sm:$0xff]   ;;  %394 = vmatprep.subr.bf16.mxu1 %v465_v2  ;;  %v419_v3 = vld [vmem:[%s616_s2 + $0x48] sm:$0xff]   ;;  %v421_v5 = vld [vmem:[%s616_s2 + $0x50] sm:$0xff]  }
   0x2   :  { %v418_v1 = vld [vmem:[%s616_s2] sm:$0xff]   ;;  %363 = vmatprep.subr.bf16.mxu0 %v417_v0  ;;  %v420_v4 = vld [vmem:[%s616_s2 + $0x8] sm:$0xff]   ;;  %v422_v6 = vld [vmem:[%s616_s2 + $0x10] sm:$0xff]  }
   0x3   :  { %364 = vmatpush3.bf16.msra.mxu0 %v418_v1  ;;  %v423_v7 = vld [vmem:[%s616_s2 + $0x58] sm:$0xff]   ;;  %v425_v9 = vld [vmem:[%s616_s2 + $0x60] sm:$0xff]   ;;  %v427_v11 = vld [vmem:[%s616_s2 + $0x68] sm:$0xff]  }
   0x4   :  { %365 = vmatprep.subr.bf16.mxu0 %v419_v3  ;;  %v424_v8 = vld [vmem:[%s616_s2 + $0x18] sm:$0xff]   ;;  %v426_v10 = vld [vmem:[%s616_s2 + $0x20] sm:$0xff]   ;;  %v26_v12 = vld [vmem:[%s614_s0 + $0x8] sm:$0xff] }
   0x5   :  { %v28_v13 = vld [vmem:[%s615_s1 + $0x8] sm:$0xff]  ;;  %v433_v16 = vld [vmem:[%s618_s4] sm:$0xff]   ;;  %v429_v17 = vld [vmem:[%s616_s2 + $0x70] sm:$0xff]  }
   0x6   :  { %v428_v14 = vld [vmem:[%s616_s2 + $0x28] sm:$0xff]   ;;  %v30_v15 = vadd.f32 %v28_v13, %v26_v12  ;;  %395 = vmatpush3.bf16.msra.mxu1 %v433_v16  ;;  %v430_v20 = vld [vmem:[%s616_s2 + $0x30] sm:$0xff]   ;;  %v25_v21 = vld [vmem:[%s614_s0] sm:$0xff] }
   0x7   :  { %366 = vmatpush3.bf16.msra.mxu0 %v420_v4  ;;  %v434_v19 = vld [vmem:[%s618_s4 + $0x8] sm:$0xff]   ;;  %396 = vmatprep.subr.bf16.mxu1 %v465_v2  ;;  %v431_v22 = vld [vmem:[%s616_s2 + $0x78] sm:$0xff]   ;;  %v27_v23 = vld [vmem:[%s615_s1] sm:$0xff] }
   0x8   :  { %367 = vmatprep.subr.bf16.mxu0 %v421_v5  ;;  %v32_v18 = vpack.c.bf16 %v30_v15, %v30_v15  ;;  %v435_v24 = vld [vmem:[%s618_s4 + $0x10] sm:$0xff]  }
   0xa   :  { %200 = vmatprep.mubr.bf16.mxu0 %v32_v18  ;;  %397 = vmatpush3.bf16.msra.mxu1 %v434_v19 }
   0xb   :  { %368 = vmatpush3.bf16.msra.mxu0 %v422_v6 }
   0xc   :  { %369 = vmatprep.subr.bf16.mxu0 %v423_v7 }
   0xf   :  { %370 = vmatpush3.bf16.msra.mxu0 %v424_v8 }
  0x10   :  { %371 = vmatprep.subr.bf16.mxu0 %v425_v9 }
  0x13   :  { %372 = vmatpush3.bf16.msra.mxu0 %v426_v10 }
  0x14   :  { %373 = vmatprep.subr.bf16.mxu0 %v427_v11 }
  0x17   :  { %374 = vmatpush3.bf16.msra.mxu0 %v428_v14 }
  0x18   :  { %375 = vmatprep.subr.bf16.mxu0 %v429_v17 }
  0x19   :  { %11 = vsyncpa [#allocation3], 0  ;;  %398 = vmatprep.subr.bf16.mxu1 %v465_v2  ;;  %v29_v25 = vadd.f32 %v27_v23, %v25_v21  ;;  %v432_v26 = vld [vmem:[%s616_s2 + $0x38] sm:$0xff]   ;;  %v437_v29 = vld [vmem:[%s618_s4 + $0x20] sm:$0xff]   ;;  %vm466_vm0 = vmmov 0  }
  0x1a   :  { %399 = vmatpush3.bf16.msra.mxu1 %v435_v24  ;;  %v436_v27 = vld [vmem:[%s618_s4 + $0x18] sm:$0xff]   ;;  %v438_v30 = vld [vmem:[%s618_s4 + $0x28] sm:$0xff]   ;;  %v439_v31 = vld [vmem:[%s618_s4 + $0x30] sm:$0xff]   ;;  %410 = vmatprep.mubr.msk.bf16.mxu1 %vm466_vm0, %v465_v2 }
  0x1b   :  { %376 = vmatpush3.bf16.msra.mxu0 %v430_v20  ;;  %400 = vmatprep.subr.bf16.mxu1 %v465_v2  ;;  %v31_v28 = vpack.c.bf16 %v29_v25, %v29_v25  ;;  %v440_v32 = vld [vmem:[%s618_s4 + $0x38] sm:$0xff]   ;;  %v337_v34 = vld [vmem:[%s617_s3] ss:$0 sm:$0xff]  ;;  %s467_s4 = smov [#allocation2]  }
  0x1c   :  { %377 = vmatprep.subr.bf16.mxu0 %v431_v22  ;;  %v354_v42 = vld [vmem:[%s619_s5] ss:$0 sm:$0xff]  ;;  %s329_s30 = sshll.u32 %s467_s4, 4  ;;  %s330_s30 = int_to_ptr.vmem [resolvable:$true] %s329_s30 }
  0x1d   :  { %s441_s3 = scalar_lea.vmem %s330_s30, 128  ;;  %p446_p1 = scmp.lt.s32.totalorder %s330_s30, %s330_s30 }
  0x1e   :  { %401 = vmatpush3.bf16.msra.mxu1 %v436_v27  ;;  %p442_p0 = scmp.ne.s32.totalorder %s330_s30, %s441_s3  ;;  %p447_p2 = scmp.lt.s32.totalorder %s441_s3, %s441_s3 }
  0x1f   :  { %378 = vmatpush3.bf16.msra.mxu0 %v432_v26  ;;  %402 = vmatprep.subr.bf16.mxu1 %v465_v2 }
  0x20   :  { %p448_p3 = por %p447_p2, %p446_p1 }
  0x22   :  { %201 = vmatmul.mubr.bf16.vlgmr.msra.gmra.mrb[0].mxu0 %v31_v28  ;;  %403 = vmatpush3.bf16.msra.mxu1 %v437_v29  ;;  %p449_p4 = pnand %p448_p3, %p442_p0 }
  0x23   :  { %404 = vmatprep.subr.bf16.mxu1 %v465_v2 }
  0x26   :  { %405 = vmatpush3.bf16.msra.mxu1 %v438_v30 }
  0x27   :  { %406 = vmatprep.subr.bf16.mxu1 %v465_v2 }
  0x2a   :  { %407 = vmatpush3.bf16.msra.mxu1 %v439_v31 }
  0x2b   :  { %408 = vmatprep.subr.bf16.mxu1 %v465_v2 }
  0x2e   :  { %409 = vmatpush3.bf16.msra.mxu1 %v440_v32 }
  0xf5   :  { %v379_v33 = vpop.f32.mrb[0].mxu0 }
  0xf6   :  { %v380_v35 = vpop.f32.mrb[1].mxu0 }
  0xf7   :  { %v381_v36 = vadd.f32 %v380_v35, %v379_v33  ;;  %v382_v37 = vpop.f32.mrb[2].mxu0 }
  0xf8   :  { %v383_v38 = vpop.f32.mrb[3].mxu0 }
  0xf9   :  { %v203_v39 = vadd.f32 %v381_v36, %v337_v34 }
  0xfb   :  { %v208_v40 = vmax.f32 %v203_v39, 0.0 }
  0xfd   :  { %v209_v41 = vpack.c.bf16 %v208_v40, %v208_v40 }
  0xff   :  { %411 = vmatmul.mubr.bf16.vlgmr.msra.gmra.mrb[0].mxu1 %v209_v41 }
 0x1d2   :  { %v315_v43 = vpop.f32.mrb[0].mxu1 }
 0x1d3   :  { %v316_v44 = vadd.f32 %v354_v42, %v315_v43  ;;  %v412_v45 = vpop.f32.mrb[1].mxu1 }
 0x1d4   :  { %v318_v46 = vpop.f32.mrb[2].mxu1 }
 0x1d5   :  { %v321_v47 = vmax.f32 %v316_v44, 0.0  ;;  %v413_v48 = vpop.f32.mrb[3].mxu1 }
 0x1d7   :  { %322 = vst [vmem:[#allocation2] sm:$0xff] %v321_v47 }
 0x1d8   :  { %452 = shalt.err (!%p449_p4)
}
 0x1d9   :  { %s453_s5 = scalar_lea.hbm %s620_s6, 128 }
 0x1da   :  { %p454_p5 = scmp.ne.s32.totalorder %s620_s6, %s453_s5  ;;  %p457_p6 = scmp.lt.u32.totalorder %s453_s5, %s620_s6 }
 0x1dc   :  { %p459_p7 = pnand %p457_p6, %p454_p5 }
 0x1de   :  { %462 = shalt.err (!%p459_p7)
}
 0x1df   :  { %332 = dma.vmem_to_hbm [thread:$0]  %s330_s30, 128, %s620_s6, [#allocation3]  }
 0x1e0   :  { %463 = dma.done.wait [#allocation3], 128  }
 0x1e1   :  { %464 = vsyncadd [#allocation3], 4294967168 }
 0x1e2   :  { %336 = vsyncpa [#allocation3], 1 }

</bundles_post_ra>
